<compile_context>
chip_gen: v7x
topology: tpu7x:2x2x1
jax: 0.10.0
libtpu: 0.0.40
codegen_flags: <defaults>
</compile_context>

<pallas_src>
import functools

import jax
import jax.numpy as jnp
import numpy as np
from jax.experimental import pallas as pl
from jax.experimental.pallas import tpu as pltpu

EPS = 1e-5


# ----------------------------- hardware query -----------------------------

@functools.lru_cache(maxsize=None)
def _vmem_cap():
    """Physical VMEM bytes (conservative 64 MiB fallback, i.e. v7x)."""
    try:
        info = pltpu.get_tpu_info()
        for attr in ("vmem_capacity_bytes", "vmem_size_bytes", "vmem_bytes"):
            v = getattr(info, attr, None)
            if v:
                return int(v)
    except Exception:
        pass
    return 64 << 20


def _big_vmem():
    return _vmem_cap() >= (96 << 20)       # v5e / v6e (128 MiB) vs v7x (64 MiB)


# ----------------------------- tiling helpers -----------------------------

def _row_tile(m, target=256):
    """Largest multiple-of-16 divisor of m that is <= target (else m)."""
    if m <= target:
        return m
    for t in range(target - target % 16, 15, -16):
        if m % t == 0:
            return t
    return m


def _channel_tile(c, target=256):
    """Output-channel tile: full if small, else a 128-multiple divisor."""
    if c <= target:
        return c
    for t in range(target, 127, -128):
        if c % t == 0:
            return t
    return c


def _conv_row_tile(Ho, Wo, target=256):
    """Row tile th for the 3x3 conv: th divides Ho, and th*Wo is either a
    multiple of 8 (aligned sublane block) or the full Ho*Wo extent."""
    cands = [t for t in range(1, Ho + 1)
             if Ho % t == 0 and (t == Ho or (t * Wo) % 8 == 0)]
    fit = [t for t in cands if t * Wo <= target]
    return max(fit) if fit else min(cands)


def _compiler_params(sem, block_bytes):
    # 2x for double-buffering of each block + headroom, capped at 85% of the
    # queried physical VMEM (raises the cap on 128 MiB chips, protects v7x).
    cap = int(_vmem_cap() * 0.85)
    limit = int(min(max(2 * block_bytes + (8 << 20), 16 << 20), cap))
    return pltpu.CompilerParams(dimension_semantics=sem,
                                vmem_limit_bytes=limit)


# ---------------------------- Pallas kernels ----------------------------

def _matmul_bn_kernel(x_ref, w_ref, scale_ref, shift_ref, o_ref, *, relu):
    # 1x1 conv tile == matmul over channels, fused with BN affine (+ ReLU).
    acc = jnp.dot(x_ref[...], w_ref[...], preferred_element_type=jnp.float32)
    y = acc * scale_ref[...] + shift_ref[...]
    if relu:
        y = jnp.maximum(y, 0.0)
    o_ref[...] = y.astype(o_ref.dtype)


def _matmul_bn_add_relu_kernel(x_ref, w_ref, scale_ref, shift_ref, res_ref,
                               o_ref):
    # conv3 (1x1) + bn3 + residual add + final ReLU, fully fused.
    acc = jnp.dot(x_ref[...], w_ref[...], preferred_element_type=jnp.float32)
    y = acc * scale_ref[...] + shift_ref[...] + res_ref[...].astype(jnp.float32)
    o_ref[...] = jnp.maximum(y, 0.0).astype(o_ref.dtype)


def _conv_bn_relu_kernel(x_ref, w_ref, scale_ref, shift_ref, o_ref,
                         *, K, TH, Wo):
    # Dense KxK stride-1 conv on one (row-tile, Cout-tile) of the output,
    # fused BN affine + ReLU.
    #   x_ref : (1, Hs, Ws, Cin)  full padded image, resident across (t, c)
    #   w_ref : (K, K, Cin, TC)   one Cout tile of the taps (no lane concat)
    #   o_ref : (1, TH*Wo, TC)    flattened row tile -> lane-dense store,
    #                             no (TH, Wo) sublane repack in the epilogue.
    Cin = x_ref.shape[-1]
    TC = o_ref.shape[-1]
    t = pl.program_id(1)
    row0 = pl.multiple_of(t * TH, TH)
    x_win = x_ref[0, pl.ds(row0, TH + K - 1), :, :]        # (TH+K-1, Ws, Cin)
    acc = jnp.zeros((TH * Wo, TC), jnp.float32)
    for dj in range(K):
        # One column-window slice per dj (K per grid step), flattened once and
        # reused for the K row taps (cheap contiguous row slices).  K*K small
        # MXU dots replace the old lane-axis tap concatenation.
        # TODO(synk): for Cin=64 stages, pad Cin to 128 (aligned concat) to
        # deepen the MXU contraction; not needed for these demo shapes.
        col = x_win[:, dj:dj + Wo, :].reshape((TH + K - 1) * Wo, Cin)
        for di in range(K):
            tap = col[di * Wo:di * Wo + TH * Wo, :]        # (TH*Wo, Cin)
            acc = acc + jnp.dot(tap, w_ref[di, dj],
                                preferred_element_type=jnp.float32)
    y = jnp.maximum(acc * scale_ref[...] + shift_ref[...], 0.0)
    o_ref[0] = y.astype(o_ref.dtype)


# ------------------------- pallas_call wrappers -------------------------

def _mm_order(M, Cin, Cout, tm, tn, itemsize):
    """Pick grid order so the larger operand is resident (not re-streamed)."""
    gi, gj = M // tm, Cout // tn
    weights_outer = (gi - 1) * (Cin * Cout * itemsize) > \
                    (gj - 1) * (M * Cin * itemsize)
    if weights_outer:
        grid = (gj, gi)
        i_of = lambda a, b: b
        j_of = lambda a, b: a
    else:
        grid = (gi, gj)
        i_of = lambda a, b: a
        j_of = lambda a, b: b
    return grid, i_of, j_of


def conv1x1_bn(x2d, w, scale, shift, *, relu, out_dtype):
    M, Cin = x2d.shape
    Cout = w.shape[1]
    tm = _row_tile(M, 512 if _big_vmem() else 256)
    tn = _channel_tile(Cout, 256)
    itm = x2d.dtype.itemsize
    grid, i_of, j_of = _mm_order(M, Cin, Cout, tm, tn, itm)
    blk_bytes = ((tm * Cin + Cin * tn) * itm + 2 * tn * 4
                 + tm * tn * jnp.dtype(out_dtype).itemsize)
    return pl.pallas_call(
        functools.partial(_matmul_bn_kernel, relu=relu),
        out_shape=jax.ShapeDtypeStruct((M, Cout), out_dtype),
        grid=grid,
        in_specs=[
            pl.BlockSpec((tm, Cin), lambda a, b: (i_of(a, b), 0)),
            pl.BlockSpec((Cin, tn), lambda a, b: (0, j_of(a, b))),
            pl.BlockSpec((1, tn), lambda a, b: (0, j_of(a, b))),
            pl.BlockSpec((1, tn), lambda a, b: (0, j_of(a, b))),
        ],
        out_specs=pl.BlockSpec((tm, tn), lambda a, b: (i_of(a, b), j_of(a, b))),
        compiler_params=_compiler_params(("parallel", "parallel"), blk_bytes),
    )(x2d, w, scale, shift)


def conv1x1_bn_add_relu(x2d, w, scale, shift, res2d, *, out_dtype):
    M, Cin = x2d.shape
    Cout = w.shape[1]
    tm = _row_tile(M, 512 if _big_vmem() else 256)
    tn = _channel_tile(Cout, 256)
    itm = x2d.dtype.itemsize
    grid, i_of, j_of = _mm_order(M, Cin, Cout, tm, tn, itm)
    blk_bytes = ((tm * Cin + Cin * tn) * itm
                 + tm * tn * res2d.dtype.itemsize
                 + 2 * tn * 4 + tm * tn * jnp.dtype(out_dtype).itemsize)
    return pl.pallas_call(
        _matmul_bn_add_relu_kernel,
        out_shape=jax.ShapeDtypeStruct((M, Cout), out_dtype),
        grid=grid,
        in_specs=[
            pl.BlockSpec((tm, Cin), lambda a, b: (i_of(a, b), 0)),
            pl.BlockSpec((Cin, tn), lambda a, b: (0, j_of(a, b))),
            pl.BlockSpec((1, tn), lambda a, b: (0, j_of(a, b))),
            pl.BlockSpec((1, tn), lambda a, b: (0, j_of(a, b))),
            pl.BlockSpec((tm, tn), lambda a, b: (i_of(a, b), j_of(a, b))),
        ],
        out_specs=pl.BlockSpec((tm, tn), lambda a, b: (i_of(a, b), j_of(a, b))),
        compiler_params=_compiler_params(("parallel", "parallel"), blk_bytes),
    )(x2d, w, scale, shift, res2d)


def conv_bn_relu(x_img, w_k, scale, shift, Ho, Wo, *, out_dtype):
    # Dense KxK stride-1 conv + BN + ReLU; output tiled over (rows, Cout) and
    # returned flattened as (N, Ho*Wo, Cout).
    N, Hs, Ws, Cin = x_img.shape
    K = w_k.shape[0]
    Cout = w_k.shape[-1]
    assert Hs == Ho + K - 1 and Ws == Wo + K - 1
    th = _conv_row_tile(Ho, Wo, target=512 if _big_vmem() else 256)
    tc = _channel_tile(Cout, 256)
    itm = x_img.dtype.itemsize
    blk_bytes = (Hs * Ws * Cin * itm + K * K * Cin * tc * itm + 2 * tc * 4
                 + th * Wo * tc * jnp.dtype(out_dtype).itemsize)
    kernel = functools.partial(_conv_bn_relu_kernel, K=K, TH=th, Wo=Wo)
    return pl.pallas_call(
        kernel,
        out_shape=jax.ShapeDtypeStruct((N, Ho * Wo, Cout), out_dtype),
        grid=(N, Ho // th, Cout // tc),
        in_specs=[
            # Whole padded image stays resident across the (row, Cout) axes.
            # TODO(synk): halo'd row BlockSpec (+ single-buffered resident
            # blocks) fallback for activations too big for v7x's 64 MiB VMEM.
            pl.BlockSpec((1, Hs, Ws, Cin), lambda n, t, c: (n, 0, 0, 0)),
            pl.BlockSpec((K, K, Cin, tc), lambda n, t, c: (0, 0, 0, c)),
            pl.BlockSpec((1, tc), lambda n, t, c: (0, c)),
            pl.BlockSpec((1, tc), lambda n, t, c: (0, c)),
        ],
        out_specs=pl.BlockSpec((1, th * Wo, tc), lambda n, t, c: (n, t, c)),
        compiler_params=_compiler_params(("parallel",) * 3, blk_bytes),
    )(x_img, w_k, scale, shift)


# ------------------------------ module glue ------------------------------

def fold_bn(bn):
    s = bn["gamma"] / jnp.sqrt(bn["var"] + EPS)
    b = bn["beta"] - bn["mean"] * s
    return s.reshape(1, -1), b.reshape(1, -1)


def _prepare_conv2(x, w3x3, stride):
    """Turn the 3x3 / pad=1 / stride-s conv into a dense KxK stride-1 conv.

    For s == 1 this is plain zero padding.  For s > 1 the padded input is
    space-to-depth'd by s so the strided conv becomes a dense KxK stride-1
    conv (K = (3-1)//s + 1) over s*s*C channels with no wasted output.
    Returns (x_prep (N,Ho+K-1,Wo+K-1,Ceff), w_eff (K,K,Ceff,Cout), Ho, Wo).
    Works for odd H/W as well (pad-after = Hp - H - 1 >= 1 for s=2).
    """
    # TODO(synk): fuse the pad + space-to-depth into conv1's output BlockSpec
    # (write conv1's output directly in the s2d channel-blocked layout) to
    # save one activation-sized HBM round trip.
    N, H, W, C = x.shape
    Cout = w3x3.shape[-1]
    s = stride
    Ho = (H - 1) // s + 1
    Wo = (W - 1) // s + 1
    if s == 1:
        return jnp.pad(x, ((0, 0), (1, 1), (1, 1), (0, 0))), w3x3, Ho, Wo
    K = (3 - 1) // s + 1
    Hp, Wp = s * (Ho + K - 1), s * (Wo + K - 1)
    xp = jnp.pad(x, ((0, 0), (1, Hp - H - 1), (1, Wp - W - 1), (0, 0)))
    Ceff = s * s * C
    xp = xp.reshape(N, Hp // s, s, Wp // s, s, C)
    xp = xp.transpose(0, 1, 3, 2, 4, 5).reshape(N, Hp // s, Wp // s, Ceff)
    w_eff = jnp.zeros((K, K, Ceff, Cout), w3x3.dtype)
    for a in range(K):            # super-row tap (kernel row)
        for b in range(K):        # super-col tap (kernel col)
            for dr in range(s):
                for dc in range(s):
                    di, dj = s * a + dr, s * b + dc
                    if di < 3 and dj < 3:
                        blk = (dr * s + dc) * C
                        w_eff = w_eff.at[a, b, blk:blk + C, :].set(w3x3[di, dj])
    return xp, w_eff, Ho, Wo


@functools.partial(jax.jit, static_argnames=("stride", "compute_dtype"))
def bottleneck_forward(x_nchw, params, stride, compute_dtype=jnp.bfloat16):
    # TODO(synk): keep NHWC end-to-end across stacked blocks (transpose only
    # at network boundaries) to drop these per-block NCHW<->NHWC copies.
    N, Cin, H, W = x_nchw.shape
    out_dtype = x_nchw.dtype
    x = jnp.transpose(x_nchw, (0, 2, 3, 1)).astype(compute_dtype)  # NCHW->NHWC
    planes = params["w1"].shape[1]
    out_planes = params["w3"].shape[1]

    w1 = params["w1"].astype(compute_dtype)
    w2 = params["w2"].astype(compute_dtype)
    w3 = params["w3"].astype(compute_dtype)

    s1, b1 = fold_bn(params["bn1"])
    s2, b2 = fold_bn(params["bn2"])
    s3, b3 = fold_bn(params["bn3"])

    # conv1 (1x1, no bias) + bn1 + relu
    out = conv1x1_bn(x.reshape(N * H * W, Cin), w1, s1, b1,
                     relu=True, out_dtype=compute_dtype)
    out = out.reshape(N, H, W, planes)

    # conv2 (3x3, padding=1, stride) + bn2 + relu, stride fused via s2d.
    x2, w2k, Ho, Wo = _prepare_conv2(out, w2, stride)
    out = conv_bn_relu(x2, w2k, s2, b2, Ho, Wo,
                       out_dtype=compute_dtype)             # (N, Ho*Wo, planes)

    # shortcut branch
    if stride != 1 or Cin != out_planes:
        w_sc = params["w_sc"].astype(compute_dtype)
        s_sc, b_sc = fold_bn(params["bn_sc"])
        # TODO(synk): fold the stride-2 subsample into the 1x1 kernel's input
        # BlockSpec (strided pl.ds) to avoid this XLA-side gather round trip.
        xs = x[:, ::stride, ::stride, :].reshape(N * Ho * Wo, Cin)
        res = conv1x1_bn(xs, w_sc, s_sc, b_sc, relu=False,
                         out_dtype=compute_dtype)
    else:
        res = x.reshape(N * Ho * Wo, Cin)

    # conv3 (1x1) + bn3 + residual add + relu (fused)
    out = conv1x1_bn_add_relu(out.reshape(N * Ho * Wo, planes), w3, s3, b3,
                              res, out_dtype=out_dtype)
    out = out.reshape(N, Ho, Wo, out_planes)
    return jnp.transpose(out, (0, 3, 1, 2))                  # NHWC -> NCHW


def make_params(key, in_planes, planes, expansion=4):
    out_planes = expansion * planes
    ks = jax.random.split(key, 8)

    def bn_params(k, c):
        k1, k2, k3, k4 = jax.random.split(k, 4)
        return dict(
            gamma=jax.random.uniform(k1, (c,), jnp.float32, 0.5, 1.5),
            beta=jax.random.normal(k2, (c,), jnp.float32) * 0.1,
            mean=jax.random.normal(k3, (c,), jnp.float32) * 0.1,
            var=jax.random.uniform(k4, (c,), jnp.float32, 0.5, 1.5),
        )

    # conv weights stored channels-last: 1x1 as (Cin, Cout), 3x3 as (3,3,Cin,Cout)
    return dict(
        w1=jax.random.normal(ks[0], (in_planes, planes), jnp.float32) * 0.1,
        w2=jax.random.normal(ks[1], (3, 3, planes, planes), jnp.float32) * 0.1,
        w3=jax.random.normal(ks[2], (planes, out_planes), jnp.float32) * 0.1,
        w_sc=jax.random.normal(ks[3], (in_planes, out_planes), jnp.float32) * 0.1,
        bn1=bn_params(ks[4], planes),
        bn2=bn_params(ks[5], planes),
        bn3=bn_params(ks[6], out_planes),
        bn_sc=bn_params(ks[7], out_planes),
    )


# ---------------------------- pure-JAX reference ----------------------------

def reference_bottleneck(x_nchw, p, stride):
    hp = jax.lax.Precision.HIGHEST
    x = jnp.transpose(x_nchw, (0, 2, 3, 1))
    out_planes = p["w3"].shape[1]

    def bn(y, q):
        s = q["gamma"] / jnp.sqrt(q["var"] + EPS)
        b = q["beta"] - q["mean"] * s
        return y * s.reshape(1, 1, 1, -1) + b.reshape(1, 1, 1, -1)

    out = jax.nn.relu(bn(jnp.einsum("nhwc,cd->nhwd", x, p["w1"], precision=hp),
                         p["bn1"]))
    out = jax.lax.conv_general_dilated(
        out, p["w2"], window_strides=(stride, stride), padding=((1, 1), (1, 1)),
        dimension_numbers=("NHWC", "HWIO", "NHWC"), precision=hp)
    out = jax.nn.relu(bn(out, p["bn2"]))
    out = bn(jnp.einsum("nhwc,cd->nhwd", out, p["w3"], precision=hp), p["bn3"])
    if stride != 1 or x.shape[-1] != out_planes:
        xs = x[:, ::stride, ::stride, :]
        sc = bn(jnp.einsum("nhwc,cd->nhwd", xs, p["w_sc"], precision=hp),
                p["bn_sc"])
    else:
        sc = x
    out = jax.nn.relu(out + sc)
    return jnp.transpose(out, (0, 3, 1, 2))


# ---------------------------------- main ----------------------------------

if __name__ == "__main__":
    key = jax.random.PRNGKey(0)
    kx, kp, kp2, kp3 = jax.random.split(key, 4)

    N, H, W = 2, 16, 16

    # Config A: stride 2, in_planes != expansion*planes -> conv shortcut,
    # exercises the space-to-depth (K=2) conv path and the M-tiled 1x1 convs.
    in_planes, planes, stride = 16, 8, 2
    x = jax.random.normal(kx, (N, in_planes, H, W), jnp.float32)     # NCHW
    params = make_params(kp, in_planes, planes)

    out_bf16 = jax.block_until_ready(
        bottleneck_forward(x, params, stride=stride,
                           compute_dtype=jnp.bfloat16))
    out_f32 = jax.block_until_ready(
        bottleneck_forward(x, params, stride=stride,
                           compute_dtype=jnp.float32))
    ref = reference_bottleneck(x, params, stride)
    assert out_bf16.shape == ref.shape == (N, 4 * planes, H // stride, W // stride)
    np.testing.assert_allclose(np.asarray(out_f32), np.asarray(ref),
                               rtol=5e-3, atol=5e-3)
    # bf16 MXU path: sanity check with a looser tolerance.
    np.testing.assert_allclose(np.asarray(out_bf16), np.asarray(ref),
                               rtol=5e-2, atol=5e-2)

    # Config B: stride 1 with identity shortcut, exercises the dense 3x3 (K=3)
    # path and the weights-resident grid order in the 1x1 convs.
    in_planes2, planes2, stride2 = 32, 8, 1
    x2 = jax.random.normal(kx, (N, in_planes2, H, W), jnp.float32)
    params2 = make_params(kp2, in_planes2, planes2)
    out2 = jax.block_until_ready(
        bottleneck_forward(x2, params2, stride=stride2,
                           compute_dtype=jnp.float32))
    ref2 = reference_bottleneck(x2, params2, stride2)
    np.testing.assert_allclose(np.asarray(out2), np.asarray(ref2),
                               rtol=5e-3, atol=5e-3)

    # Config C: odd spatial size (15x15), stride 2 -> exercises the odd-size
    # padding arithmetic of the space-to-depth transform.
    H3 = W3 = 15
    in_planes3, planes3, stride3 = 16, 8, 2
    x3 = jax.random.normal(kx, (N, in_planes3, H3, W3), jnp.float32)
    params3 = make_params(kp3, in_planes3, planes3)
    out3 = jax.block_until_ready(
        bottleneck_forward(x3, params3, stride=stride3,
                           compute_dtype=jnp.float32))
    ref3 = reference_bottleneck(x3, params3, stride3)
    assert out3.shape == (N, 4 * planes3, 8, 8)
    np.testing.assert_allclose(np.asarray(out3), np.asarray(ref3),
                               rtol=5e-3, atol=5e-3)

    print("KERNEL_OK")
</pallas_src>

<mosaic_0001>
module attributes {stable_mosaic.version = 11 : i64} {
  func.func @_matmul_bn_kernel(%arg0: i32, %arg1: i32, %arg2: memref<128x16xbf16, #tpu.memory_space<vmem>>, %arg3: memref<16x32xbf16, #tpu.memory_space<vmem>>, %arg4: memref<1x32xf32, #tpu.memory_space<vmem>>, %arg5: memref<1x32xf32, #tpu.memory_space<vmem>>, %arg6: memref<128x32xbf16, #tpu.memory_space<vmem>>) attributes {dimension_semantics = [#tpu.dimension_semantics<parallel>, #tpu.dimension_semantics<parallel>], iteration_bounds = array<i64: 1, 1>, scalar_prefetch = 0 : i64, scratch_operands = 0 : i64, tpu.core_type = #tpu.core_type<tc>, window_params = [{transform_indices = @transform_0, window_bounds = array<i64: 128, 16>}, {transform_indices = @transform_1, window_bounds = array<i64: 16, 32>}, {transform_indices = @transform_2, window_bounds = array<i64: 1, 32>}, {transform_indices = @transform_3, window_bounds = array<i64: 1, 32>}, {transform_indices = @transform_4, window_bounds = array<i64: 128, 32>}]} {
    %c0 = arith.constant 0 : index
    %c0_0 = arith.constant 0 : index
    %0 = vector.load %arg2[%c0, %c0_0] : memref<128x16xbf16, #tpu.memory_space<vmem>>, vector<128x16xbf16>
    %c0_1 = arith.constant 0 : index
    %c0_2 = arith.constant 0 : index
    %1 = vector.load %arg3[%c0_1, %c0_2] : memref<16x32xbf16, #tpu.memory_space<vmem>>, vector<16x32xbf16>
    %cst = arith.constant dense<0.000000e+00> : vector<128x32xf32>
    %2 = tpu.matmul %0, %1, %cst {dimension_numbers = #tpu.dot_dimension_numbers<[1], [0], [0], [1], [0, 0, 1, 1], [], []>} : vector<128x16xbf16>, vector<16x32xbf16>, vector<128x32xf32> -> vector<128x32xf32>
    %c0_3 = arith.constant 0 : index
    %c0_4 = arith.constant 0 : index
    %3 = vector.load %arg4[%c0_3, %c0_4] : memref<1x32xf32, #tpu.memory_space<vmem>>, vector<1x32xf32>
    %4 = vector.broadcast %3 : vector<1x32xf32> to vector<128x32xf32>
    %5 = arith.mulf %2, %4 : vector<128x32xf32>
    %c0_5 = arith.constant 0 : index
    %c0_6 = arith.constant 0 : index
    %6 = vector.load %arg5[%c0_5, %c0_6] : memref<1x32xf32, #tpu.memory_space<vmem>>, vector<1x32xf32>
    %7 = vector.broadcast %6 : vector<1x32xf32> to vector<128x32xf32>
    %8 = arith.addf %5, %7 : vector<128x32xf32>
    %9 = arith.truncf %8 : vector<128x32xf32> to vector<128x32xbf16>
    %c0_7 = arith.constant 0 : index
    %c0_8 = arith.constant 0 : index
    %10 = vector.load %arg6[%c0_7, %c0_8] : memref<128x32xbf16, #tpu.memory_space<vmem>>, vector<128x32xbf16>
    tpu.vector_store %arg6[%c0_7, %c0_8], %9 {strides = array<i32>} : memref<128x32xbf16, #tpu.memory_space<vmem>>, vector<128x32xbf16>,
    return
  }
  func.func @transform_0(%arg0: i32, %arg1: i32) -> (i32, i32) {
    %c0_i32 = arith.constant 0 : i32
    %c0_i32_0 = arith.constant 0 : i32
    return %arg0, %c0_i32 : i32, i32
  }
  func.func @transform_1(%arg0: i32, %arg1: i32) -> (i32, i32) {
    %c0_i32 = arith.constant 0 : i32
    %c0_i32_0 = arith.constant 0 : i32
    return %c0_i32, %arg1 : i32, i32
  }
  func.func @transform_2(%arg0: i32, %arg1: i32) -> (i32, i32) {
    %c0_i32 = arith.constant 0 : i32
    %c0_i32_0 = arith.constant 0 : i32
    return %c0_i32, %arg1 : i32, i32
  }
  func.func @transform_3(%arg0: i32, %arg1: i32) -> (i32, i32) {
    %c0_i32 = arith.constant 0 : i32
    %c0_i32_0 = arith.constant 0 : i32
    return %c0_i32, %arg1 : i32, i32
  }
  func.func @transform_4(%arg0: i32, %arg1: i32) -> (i32, i32) {
    %c0_i32 = arith.constant 0 : i32
    return %arg0, %arg1 : i32, i32
  }
}

module attributes {stable_mosaic.version = 11 : i64} {
  func.func @_matmul_bn_kernel(%arg0: i32, %arg1: i32, %arg2: memref<256x16xbf16, #tpu.memory_space<vmem>>, %arg3: memref<16x8xbf16, #tpu.memory_space<vmem>>, %arg4: memref<1x8xf32, #tpu.memory_space<vmem>>, %arg5: memref<1x8xf32, #tpu.memory_space<vmem>>, %arg6: memref<256x8xbf16, #tpu.memory_space<vmem>>) attributes {dimension_semantics = [#tpu.dimension_semantics<parallel>, #tpu.dimension_semantics<parallel>], iteration_bounds = array<i64: 1, 2>, scalar_prefetch = 0 : i64, scratch_operands = 0 : i64, tpu.core_type = #tpu.core_type<tc>, window_params = [{transform_indices = @transform_0, window_bounds = array<i64: 256, 16>}, {transform_indices = @transform_1, window_bounds = array<i64: 16, 8>}, {transform_indices = @transform_2, window_bounds = array<i64: 1, 8>}, {transform_indices = @transform_3, window_bounds = array<i64: 1, 8>}, {transform_indices = @transform_4, window_bounds = array<i64: 256, 8>}]} {
    %c0 = arith.constant 0 : index
    %c0_0 = arith.constant 0 : index
    %0 = vector.load %arg2[%c0, %c0_0] : memref<256x16xbf16, #tpu.memory_space<vmem>>, vector<256x16xbf16>
    %c0_1 = arith.constant 0 : index
    %c0_2 = arith.constant 0 : index
    %1 = vector.load %arg3[%c0_1, %c0_2] : memref<16x8xbf16, #tpu.memory_space<vmem>>, vector<16x8xbf16>
    %cst = arith.constant dense<0.000000e+00> : vector<256x8xf32>
    %2 = tpu.matmul %0, %1, %cst {dimension_numbers = #tpu.dot_dimension_numbers<[1], [0], [0], [1], [0, 0, 1, 1], [], []>} : vector<256x16xbf16>, vector<16x8xbf16>, vector<256x8xf32> -> vector<256x8xf32>
    %c0_3 = arith.constant 0 : index
    %c0_4 = arith.constant 0 : index
    %3 = vector.load %arg4[%c0_3, %c0_4] : memref<1x8xf32, #tpu.memory_space<vmem>>, vector<1x8xf32>
    %4 = vector.broadcast %3 : vector<1x8xf32> to vector<256x8xf32>
    %5 = arith.mulf %2, %4 : vector<256x8xf32>
    %c0_5 = arith.constant 0 : index
    %c0_6 = arith.constant 0 : index
    %6 = vector.load %arg5[%c0_5, %c0_6] : memref<1x8xf32, #tpu.memory_space<vmem>>, vector<1x8xf32>
    %7 = vector.broadcast %6 : vector<1x8xf32> to vector<256x8xf32>
    %8 = arith.addf %5, %7 : vector<256x8xf32>
    %cst_7 = arith.constant 0.000000e+00 : f32
    %9 = vector.broadcast %cst_7 : f32 to vector<256x8xf32>
    %10 = arith.maximumf %8, %9 : vector<256x8xf32>
    %11 = arith.truncf %10 : vector<256x8xf32> to vector<256x8xbf16>
    %c0_8 = arith.constant 0 : index
    %c0_9 = arith.constant 0 : index
    %12 = vector.load %arg6[%c0_8, %c0_9] : memref<256x8xbf16, #tpu.memory_space<vmem>>, vector<256x8xbf16>
    tpu.vector_store %arg6[%c0_8, %c0_9], %11 {strides = array<i32>} : memref<256x8xbf16, #tpu.memory_space<vmem>>, vector<256x8xbf16>,
    return
  }
  func.func @transform_0(%arg0: i32, %arg1: i32) -> (i32, i32) {
    %c0_i32 = arith.constant 0 : i32
    %c0_i32_0 = arith.constant 0 : i32
    return %arg1, %c0_i32 : i32, i32
  }
  func.func @transform_1(%arg0: i32, %arg1: i32) -> (i32, i32) {
    %c0_i32 = arith.constant 0 : i32
    %c0_i32_0 = arith.constant 0 : i32
    return %c0_i32, %arg0 : i32, i32
  }
  func.func @transform_2(%arg0: i32, %arg1: i32) -> (i32, i32) {
    %c0_i32 = arith.constant 0 : i32
    %c0_i32_0 = arith.constant 0 : i32
    return %c0_i32, %arg0 : i32, i32
  }
  func.func @transform_3(%arg0: i32, %arg1: i32) -> (i32, i32) {
    %c0_i32 = arith.constant 0 : i32
    %c0_i32_0 = arith.constant 0 : i32
    return %c0_i32, %arg0 : i32, i32
  }
  func.func @transform_4(%arg0: i32, %arg1: i32) -> (i32, i32) {
    %c0_i32 = arith.constant 0 : i32
    return %arg1, %arg0 : i32, i32
  }
}

module attributes {stable_mosaic.version = 11 : i64} {
  func.func @_conv_bn_relu_kernel(%arg0: i32, %arg1: i32, %arg2: i32, %arg3: memref<1x9x9x32xbf16, #tpu.memory_space<vmem>>, %arg4: memref<2x2x32x8xbf16, #tpu.memory_space<vmem>>, %arg5: memref<1x8xf32, #tpu.memory_space<vmem>>, %arg6: memref<1x8xf32, #tpu.memory_space<vmem>>, %arg7: memref<1x64x8xbf16, #tpu.memory_space<vmem>>) attributes {dimension_semantics = [#tpu.dimension_semantics<parallel>, #tpu.dimension_semantics<parallel>, #tpu.dimension_semantics<parallel>], iteration_bounds = array<i64: 2, 1, 1>, scalar_prefetch = 0 : i64, scratch_operands = 0 : i64, tpu.core_type = #tpu.core_type<tc>, window_params = [{transform_indices = @transform_0, window_bounds = array<i64: 1, 9, 9, 32>}, {transform_indices = @transform_1, window_bounds = array<i64: 2, 2, 32, 8>}, {transform_indices = @transform_2, window_bounds = array<i64: 1, 8>}, {transform_indices = @transform_3, window_bounds = array<i64: 1, 8>}, {transform_indices = @transform_4, window_bounds = array<i64: 1, 64, 8>}]} {
    %c8_i32 = arith.constant 8 : i32
    %0 = arith.muli %arg1, %c8_i32 : i32
    %1 = tpu.assume_multiple %0, 8 : i32
    %c0 = arith.constant 0 : index
    %2 = arith.index_cast %1 : i32 to index
    %c0_0 = arith.constant 0 : index
    %c0_1 = arith.constant 0 : index
    %3 = vector.load %arg3[%c0, %2, %c0_0, %c0_1] : memref<1x9x9x32xbf16, #tpu.memory_space<vmem>>, vector<1x9x9x32xbf16>
    %4 = vector.shape_cast %3 : vector<1x9x9x32xbf16> to vector<9x9x32xbf16>
    %cst = arith.constant 0.000000e+00 : f32
    %5 = vector.broadcast %cst : f32 to vector<64x8xf32>
    %6 = vector.extract_strided_slice %4 {offsets = [0, 0, 0], sizes = [9, 8, 32], strides = [1, 1, 1]} : vector<9x9x32xbf16> to vector<9x8x32xbf16>
    %7 = vector.shape_cast %6 : vector<9x8x32xbf16> to vector<72x32xbf16>
    %8 = vector.extract_strided_slice %7 {offsets = [0, 0], sizes = [64, 32], strides = [1, 1]} : vector<72x32xbf16> to vector<64x32xbf16>
    %c0_2 = arith.constant 0 : index
    %c0_3 = arith.constant 0 : index
    %c0_4 = arith.constant 0 : index
    %c0_5 = arith.constant 0 : index
    %9 = vector.load %arg4[%c0_2, %c0_3, %c0_4, %c0_5] : memref<2x2x32x8xbf16, #tpu.memory_space<vmem>>, vector<1x1x32x8xbf16>
    %10 = vector.shape_cast %9 : vector<1x1x32x8xbf16> to vector<32x8xbf16>
    %cst_6 = arith.constant dense<0.000000e+00> : vector<64x8xf32>
    %11 = tpu.matmul %8, %10, %cst_6 {dimension_numbers = #tpu.dot_dimension_numbers<[1], [0], [0], [1], [0, 0, 1, 1], [], []>} : vector<64x32xbf16>, vector<32x8xbf16>, vector<64x8xf32> -> vector<64x8xf32>
    %12 = arith.addf %5, %11 : vector<64x8xf32>
    %13 = vector.extract_strided_slice %7 {offsets = [8, 0], sizes = [64, 32], strides = [1, 1]} : vector<72x32xbf16> to vector<64x32xbf16>
    %c1 = arith.constant 1 : index
    %c0_7 = arith.constant 0 : index
    %c0_8 = arith.constant 0 : index
    %c0_9 = arith.constant 0 : index
    %14 = vector.load %arg4[%c1, %c0_7, %c0_8, %c0_9] : memref<2x2x32x8xbf16, #tpu.memory_space<vmem>>, vector<1x1x32x8xbf16>
    %15 = vector.shape_cast %14 : vector<1x1x32x8xbf16> to vector<32x8xbf16>
    %cst_10 = arith.constant dense<0.000000e+00> : vector<64x8xf32>
    %16 = tpu.matmul %13, %15, %cst_10 {dimension_numbers = #tpu.dot_dimension_numbers<[1], [0], [0], [1], [0, 0, 1, 1], [], []>} : vector<64x32xbf16>, vector<32x8xbf16>, vector<64x8xf32> -> vector<64x8xf32>
    %17 = arith.addf %12, %16 : vector<64x8xf32>
    %18 = vector.extract_strided_slice %4 {offsets = [0, 1, 0], sizes = [9, 8, 32], strides = [1, 1, 1]} : vector<9x9x32xbf16> to vector<9x8x32xbf16>
    %19 = vector.shape_cast %18 : vector<9x8x32xbf16> to vector<72x32xbf16>
    %20 = vector.extract_strided_slice %19 {offsets = [0, 0], sizes = [64, 32], strides = [1, 1]} : vector<72x32xbf16> to vector<64x32xbf16>
    %c0_11 = arith.constant 0 : index
    %c1_12 = arith.constant 1 : index
    %c0_13 = arith.constant 0 : index
    %c0_14 = arith.constant 0 : index
    %21 = vector.load %arg4[%c0_11, %c1_12, %c0_13, %c0_14] : memref<2x2x32x8xbf16, #tpu.memory_space<vmem>>, vector<1x1x32x8xbf16>
    %22 = vector.shape_cast %21 : vector<1x1x32x8xbf16> to vector<32x8xbf16>
    %cst_15 = arith.constant dense<0.000000e+00> : vector<64x8xf32>
    %23 = tpu.matmul %20, %22, %cst_15 {dimension_numbers = #tpu.dot_dimension_numbers<[1], [0], [0], [1], [0, 0, 1, 1], [], []>} : vector<64x32xbf16>, vector<32x8xbf16>, vector<64x8xf32> -> vector<64x8xf32>
    %24 = arith.addf %17, %23 : vector<64x8xf32>
    %25 = vector.extract_strided_slice %19 {offsets = [8, 0], sizes = [64, 32], strides = [1, 1]} : vector<72x32xbf16> to vector<64x32xbf16>
    %c1_16 = arith.constant 1 : index
    %c1_17 = arith.constant 1 : index
    %c0_18 = arith.constant 0 : index
    %c0_19 = arith.constant 0 : index
    %26 = vector.load %arg4[%c1_16, %c1_17, %c0_18, %c0_19] : memref<2x2x32x8xbf16, #tpu.memory_space<vmem>>, vector<1x1x32x8xbf16>
    %27 = vector.shape_cast %26 : vector<1x1x32x8xbf16> to vector<32x8xbf16>
    %cst_20 = arith.constant dense<0.000000e+00> : vector<64x8xf32>
    %28 = tpu.matmul %25, %27, %cst_20 {dimension_numbers = #tpu.dot_dimension_numbers<[1], [0], [0], [1], [0, 0, 1, 1], [], []>} : vector<64x32xbf16>, vector<32x8xbf16>, vector<64x8xf32> -> vector<64x8xf32>
    %29 = arith.addf %24, %28 : vector<64x8xf32>
    %c0_21 = arith.constant 0 : index
    %c0_22 = arith.constant 0 : index
    %30 = vector.load %arg5[%c0_21, %c0_22] : memref<1x8xf32, #tpu.memory_space<vmem>>, vector<1x8xf32>
    %31 = vector.broadcast %30 : vector<1x8xf32> to vector<64x8xf32>
    %32 = arith.mulf %29, %31 : vector<64x8xf32>
    %c0_23 = arith.constant 0 : index
    %c0_24 = arith.constant 0 : index
    %33 = vector.load %arg6[%c0_23, %c0_24] : memref<1x8xf32, #tpu.memory_space<vmem>>, vector<1x8xf32>
    %34 = vector.broadcast %33 : vector<1x8xf32> to vector<64x8xf32>
    %35 = arith.addf %32, %34 : vector<64x8xf32>
    %cst_25 = arith.constant 0.000000e+00 : f32
    %36 = vector.broadcast %cst_25 : f32 to vector<64x8xf32>
    %37 = arith.maximumf %35, %36 : vector<64x8xf32>
    %38 = arith.truncf %37 : vector<64x8xf32> to vector<64x8xbf16>
    %c0_26 = arith.constant 0 : index
    %c0_27 = arith.constant 0 : index
    %c0_28 = arith.constant 0 : index
    %39 = vector.load %arg7[%c0_26, %c0_27, %c0_28] : memref<1x64x8xbf16, #tpu.memory_space<vmem>>, vector<1x64x8xbf16>
    %40 = vector.shape_cast %39 : vector<1x64x8xbf16> to vector<64x8xbf16>
    %41 = vector.shape_cast %38 : vector<64x8xbf16> to vector<1x64x8xbf16>
    tpu.vector_store %arg7[%c0_26, %c0_27, %c0_28], %41 {strides = array<i32>} : memref<1x64x8xbf16, #tpu.memory_space<vmem>>, vector<1x64x8xbf16>,
    return
  }
  func.func @transform_0(%arg0: i32, %arg1: i32, %arg2: i32) -> (i32, i32, i32, i32) {
    %c0_i32 = arith.constant 0 : i32
    %c0_i32_0 = arith.constant 0 : i32
    %c0_i32_1 = arith.constant 0 : i32
    %c0_i32_2 = arith.constant 0 : i32
    return %arg0, %c0_i32, %c0_i32_0, %c0_i32_1 : i32, i32, i32, i32
  }
  func.func @transform_1(%arg0: i32, %arg1: i32, %arg2: i32) -> (i32, i32, i32, i32) {
    %c0_i32 = arith.constant 0 : i32
    %c0_i32_0 = arith.constant 0 : i32
    %c0_i32_1 = arith.constant 0 : i32
    %c0_i32_2 = arith.constant 0 : i32
    return %c0_i32, %c0_i32_0, %c0_i32_1, %arg2 : i32, i32, i32, i32
  }
  func.func @transform_2(%arg0: i32, %arg1: i32, %arg2: i32) -> (i32, i32) {
    %c0_i32 = arith.constant 0 : i32
    %c0_i32_0 = arith.constant 0 : i32
    return %c0_i32, %arg2 : i32, i32
  }
  func.func @transform_3(%arg0: i32, %arg1: i32, %arg2: i32) -> (i32, i32) {
    %c0_i32 = arith.constant 0 : i32
    %c0_i32_0 = arith.constant 0 : i32
    return %c0_i32, %arg2 : i32, i32
  }
  func.func @transform_4(%arg0: i32, %arg1: i32, %arg2: i32) -> (i32, i32, i32) {
    %c0_i32 = arith.constant 0 : i32
    return %arg0, %arg1, %arg2 : i32, i32, i32
  }
}

module attributes {stable_mosaic.version = 11 : i64} {
  func.func @_matmul_bn_add_relu_kernel(%arg0: i32, %arg1: i32, %arg2: memref<128x8xbf16, #tpu.memory_space<vmem>>, %arg3: memref<8x32xbf16, #tpu.memory_space<vmem>>, %arg4: memref<1x32xf32, #tpu.memory_space<vmem>>, %arg5: memref<1x32xf32, #tpu.memory_space<vmem>>, %arg6: memref<128x32xbf16, #tpu.memory_space<vmem>>, %arg7: memref<128x32xf32, #tpu.memory_space<vmem>>) attributes {dimension_semantics = [#tpu.dimension_semantics<parallel>, #tpu.dimension_semantics<parallel>], iteration_bounds = array<i64: 1, 1>, scalar_prefetch = 0 : i64, scratch_operands = 0 : i64, tpu.core_type = #tpu.core_type<tc>, window_params = [{transform_indices = @transform_0, window_bounds = array<i64: 128, 8>}, {transform_indices = @transform_1, window_bounds = array<i64: 8, 32>}, {transform_indices = @transform_2, window_bounds = array<i64: 1, 32>}, {transform_indices = @transform_3, window_bounds = array<i64: 1, 32>}, {transform_indices = @transform_4, window_bounds = array<i64: 128, 32>}, {transform_indices = @transform_5, window_bounds = array<i64: 128, 32>}]} {
    %c0 = arith.constant 0 : index
    %c0_0 = arith.constant 0 : index
    %0 = vector.load %arg2[%c0, %c0_0] : memref<128x8xbf16, #tpu.memory_space<vmem>>, vector<128x8xbf16>
    %c0_1 = arith.constant 0 : index
    %c0_2 = arith.constant 0 : index
    %1 = vector.load %arg3[%c0_1, %c0_2] : memref<8x32xbf16, #tpu.memory_space<vmem>>, vector<8x32xbf16>
    %cst = arith.constant dense<0.000000e+00> : vector<128x32xf32>
    %2 = tpu.matmul %0, %1, %cst {dimension_numbers = #tpu.dot_dimension_numbers<[1], [0], [0], [1], [0, 0, 1, 1], [], []>} : vector<128x8xbf16>, vector<8x32xbf16>, vector<128x32xf32> -> vector<128x32xf32>
    %c0_3 = arith.constant 0 : index
    %c0_4 = arith.constant 0 : index
    %3 = vector.load %arg4[%c0_3, %c0_4] : memref<1x32xf32, #tpu.memory_space<vmem>>, vector<1x32xf32>
    %4 = vector.broadcast %3 : vector<1x32xf32> to vector<128x32xf32>
    %5 = arith.mulf %2, %4 : vector<128x32xf32>
    %c0_5 = arith.constant 0 : index
    %c0_6 = arith.constant 0 : index
    %6 = vector.load %arg5[%c0_5, %c0_6] : memref<1x32xf32, #tpu.memory_space<vmem>>, vector<1x32xf32>
    %7 = vector.broadcast %6 : vector<1x32xf32> to vector<128x32xf32>
    %8 = arith.addf %5, %7 : vector<128x32xf32>
    %c0_7 = arith.constant 0 : index
    %c0_8 = arith.constant 0 : index
    %9 = vector.load %arg6[%c0_7, %c0_8] : memref<128x32xbf16, #tpu.memory_space<vmem>>, vector<128x32xbf16>
    %10 = arith.extf %9 : vector<128x32xbf16> to vector<128x32xf32>
    %11 = arith.addf %8, %10 : vector<128x32xf32>
    %cst_9 = arith.constant 0.000000e+00 : f32
    %12 = vector.broadcast %cst_9 : f32 to vector<128x32xf32>
    %13 = arith.maximumf %11, %12 : vector<128x32xf32>
    %c0_10 = arith.constant 0 : index
    %c0_11 = arith.constant 0 : index
    %14 = vector.load %arg7[%c0_10, %c0_11] : memref<128x32xf32, #tpu.memory_space<vmem>>, vector<128x32xf32>
    tpu.vector_store %arg7[%c0_10, %c0_11], %13 {strides = array<i32>} : memref<128x32xf32, #tpu.memory_space<vmem>>, vector<128x32xf32>,
    return
  }
  func.func @transform_0(%arg0: i32, %arg1: i32) -> (i32, i32) {
    %c0_i32 = arith.constant 0 : i32
    %c0_i32_0 = arith.constant 0 : i32
    return %arg0, %c0_i32 : i32, i32
  }
  func.func @transform_1(%arg0: i32, %arg1: i32) -> (i32, i32) {
    %c0_i32 = arith.constant 0 : i32
    %c0_i32_0 = arith.constant 0 : i32
    return %c0_i32, %arg1 : i32, i32
  }
  func.func @transform_2(%arg0: i32, %arg1: i32) -> (i32, i32) {
    %c0_i32 = arith.constant 0 : i32
    %c0_i32_0 = arith.constant 0 : i32
    return %c0_i32, %arg1 : i32, i32
  }
  func.func @transform_3(%arg0: i32, %arg1: i32) -> (i32, i32) {
    %c0_i32 = arith.constant 0 : i32
    %c0_i32_0 = arith.constant 0 : i32
    return %c0_i32, %arg1 : i32, i32
  }
  func.func @transform_4(%arg0: i32, %arg1: i32) -> (i32, i32) {
    %c0_i32 = arith.constant 0 : i32
    return %arg0, %arg1 : i32, i32
  }
  func.func @transform_5(%arg0: i32, %arg1: i32) -> (i32, i32) {
    %c0_i32 = arith.constant 0 : i32
    return %arg0, %arg1 : i32, i32
  }
}

</mosaic_0001>

<bundles_post_ra>
// kernel: bottleneck_forward.4
= control target key start
LH: loop header
LB: loop body
LE: loop exit
PB: predicated region body
PF: predicated region fallthrough
CT: control target
= control target key end

     0   :  { %s1238_s15 = smov 0   ;;  %s1240_s16 = smov 0   ;;  %s1455_s0 = inlined_call_operand.vmem [shape: bf16[512,16], index: 0, kind: input, shape index: {}]   ;;  %s1456_s1 = inlined_call_operand.vmem [shape: bf16[16,8], index: 1, kind: input, shape index: {}]   ;;  %s1457_s2 = inlined_call_operand.vmem [shape: f32[1,8], index: 2, kind: input, shape index: {}]   ;;  %s1458_s3 = inlined_call_operand.vmem [shape: f32[1,8], index: 3, kind: input, shape index: {}]   ;;  %s1459_s4 = inlined_call_operand.vmem [shape: bf16[512,8], index: 4, kind: output, shape index: {}]  }
   0x1   :  { %s1242_s17 = smov 0  }
   0x2 LB: > { %s23_s18 = sadd.s32 1, %s1207_s16  ;;  %p989_p0 = scmp.ge.s32.totalorder %s1211_s17, 1  ;;  %s1211_s17 = sphi %s1242_s17, %s14_s17   ;;  %s1207_s16 = sphi %s1240_s16, %s1461_s16   ;;  %s1203_s15 = sphi %s1238_s15, %s1460_s15  }
   0x3   : > { %p24_p1 = scmp.ge.s32.totalorder %s23_s18, 2  ;;  %p202_p2 = scmp.lt.s32.totalorder %s1211_s17, 3 }
   0x5   : > { %s1463_s18 = smov (%p24_p1, %s23_s18), 0  ;;  %p203_p3 = pnand %p989_p0, %p202_p2 }
   0x6   : > { %v1172_v0 = vld [vmem:[%s1456_s1] sm:$0xff] (!%p203_p3)   ;;  %s990_s21 = sshll.u32 (!%p203_p3), %s1203_s15, 5  ;;  %vm387_vm0 = vcmask (!%p203_p3), 130048   ;;  %vm835_vm1 = vcmask (!%p203_p3), 60416  }
   0x7   : > { %206 = sbr.rel (%p203_p3) target bundleno = 270 (0x10e), region = 36  ;;  %p242_p4 = scmp.lt.s32.totalorder (!%p203_p3), %s990_s21, 63  ;;  %1112 = vmatprep.subr.bf16.mxu0 (!%p203_p3), %v1172_v0  ;;  %1146 = vmatprep.subr.bf16.mxu1 (!%p203_p3), %v1172_v0  ;;  %v1304_v17 = vld [vmem:[%s1457_s2] ss:$0 sm:$0xff] (!%p203_p3) }
   0x8   : > { %1113 = vmatpush3.bf16.msra.mxu0 (!%p203_p3), %v1172_v0  ;;  %1147 = vmatpush3.bf16.msra.mxu1 (!%p203_p3), %v1172_v0  ;;  %v1309_v19 = vld [vmem:[%s1458_s3] ss:$0 sm:$0xff] (!%p203_p3) }
   0xe   : > { %s1465_s21 = smov (!%p242_p4, %s990_s21), 63 }
   0xf   : > { %s991_s22 = sshll.u32 %s1465_s21, 2 }
  0x10   : > { %s1267_s25 = scalar_lea.vmem %s1455_s0, %s991_s22  ;;  %s1329_s6 = scalar_lea.vmem %s1459_s4, %s991_s22 }
  0x11   : > { %v1173_v1 = vld [vmem:[%s1267_s25] sm:$0xff]   ;;  %v1175_v3 = vld [vmem:[%s1267_s25 + $0x8] sm:$0xff]   ;;  %v1177_v5 = vld [vmem:[%s1267_s25 + $0x10] sm:$0xff]  }
  0x12   : > { %v1174_v2 = vld [vmem:[%s1267_s25 + $0x40] sm:$0xff]   ;;  %1114 = vmatprep.mubr.msk.bf16.mxu0 %vm387_vm0, %v1173_v1  ;;  %v1176_v4 = vld [vmem:[%s1267_s25 + $0x48] sm:$0xff]   ;;  %v1178_v6 = vld [vmem:[%s1267_s25 + $0x50] sm:$0xff]  }
  0x13   : > { %1130 = vmatprep.mubr.msk.bf16.mxu1 %vm387_vm0, %v1174_v2  ;;  %1115 = vmatmul.mubr.msk.bf16.vlgmr.msra.gmra.mrb[0].mxu0 %vm387_vm0, %v1175_v3  ;;  %v1179_v7 = vld [vmem:[%s1267_s25 + $0x18] sm:$0xff]   ;;  %v1181_v9 = vld [vmem:[%s1267_s25 + $0x20] sm:$0xff]   ;;  %v1183_v11 = vld [vmem:[%s1267_s25 + $0x28] sm:$0xff]  }
  0x14   : > { %1131 = vmatmul.mubr.msk.bf16.vlgmr.msra.gmra.mrb[0].mxu1 %vm387_vm0, %v1176_v4  ;;  %1118 = vmatprep.mubr.msk.bf16.mxu0 %vm387_vm0, %v1177_v5  ;;  %v1180_v8 = vld [vmem:[%s1267_s25 + $0x58] sm:$0xff]   ;;  %v1182_v10 = vld [vmem:[%s1267_s25 + $0x60] sm:$0xff]   ;;  %v1184_v12 = vld [vmem:[%s1267_s25 + $0x68] sm:$0xff]  }
  0x15   : > { %1134 = vmatprep.mubr.msk.bf16.mxu1 %vm387_vm0, %v1178_v6  ;;  %v1185_v13 = vld [vmem:[%s1267_s25 + $0x30] sm:$0xff]   ;;  %v1187_v15 = vld [vmem:[%s1267_s25 + $0x38] sm:$0xff]  }
  0x16   : > { %v1186_v14 = vld [vmem:[%s1267_s25 + $0x70] sm:$0xff]   ;;  %v1188_v16 = vld [vmem:[%s1267_s25 + $0x78] sm:$0xff]  }
  0x1b   : > { %1119 = vmatmul.mubr.msk.bf16.gmra.mrb[4].mxu0 %vm387_vm0, %v1179_v7 }
  0x1c   : > { %1135 = vmatmul.mubr.msk.bf16.gmra.mrb[4].mxu1 %vm387_vm0, %v1180_v8  ;;  %1122 = vmatprep.mubr.msk.bf16.mxu0 %vm387_vm0, %v1181_v9 }
  0x1d   : > { %1138 = vmatprep.mubr.msk.bf16.mxu1 %vm387_vm0, %v1182_v10 }
  0x23   : > { %1123 = vmatmul.mubr.msk.bf16.gmra.mrb[8].mxu0 %vm387_vm0, %v1183_v11 }
  0x24   : > { %1139 = vmatmul.mubr.msk.bf16.gmra.mrb[8].mxu1 %vm387_vm0, %v1184_v12  ;;  %1126 = vmatprep.mubr.msk.bf16.mxu0 %vm387_vm0, %v1185_v13 }
  0x25   : > { %1142 = vmatprep.mubr.msk.bf16.mxu1 %vm387_vm0, %v1186_v14 }
  0x2b   : > { %1127 = vmatmul.mubr.msk.bf16.gmra.mrb[12].mxu0 %vm387_vm0, %v1187_v15 }
  0x2c   : > { %1143 = vmatmul.mubr.msk.bf16.gmra.mrb[12].mxu1 %vm387_vm0, %v1188_v16 }
  0xe6   : > { %v1116_v18 = vpop.f32.mrb[0].mxu0 }
  0xe7   : > { %v606_v20 = vmul.f32 %v1116_v18, %v1304_v17  ;;  %v1132_v21 = vpop.f32.mrb[0].mxu1  ;;  %v470_v22 = vpop.f32.mrb[1].mxu0 }
  0xe8   : > { %v622_v23 = vmul.f32 %v1132_v21, %v1304_v17  ;;  %v604_v24 = vmul.f32 %v1304_v17, %v470_v22  ;;  %v534_v25 = vpop.f32.mrb[1].mxu1  ;;  %v1117_v26 = vpop.f32.mrb[2].mxu0 }
  0xe9   : > { %v645_v27 = vadd.f32 %v1309_v19, %v606_v20  ;;  %v620_v28 = vmul.f32 %v1304_v17, %v534_v25  ;;  %v607_v29 = vmul.f32 %v1117_v26, %v1304_v17  ;;  %v1133_v30 = vpop.f32.mrb[2].mxu1  ;;  %v473_v31 = vpop.f32.mrb[3].mxu0 }
  0xea   : > { %v661_v32 = vadd.f32 %v1309_v19, %v622_v23  ;;  %v643_v33 = vadd.f32 %v1309_v19, %v604_v24  ;;  %v623_v34 = vmul.f32 %v1133_v30, %v1304_v17  ;;  %v605_v35 = vmul.f32 %v1304_v17, %v473_v31  ;;  %v537_v36 = vpop.f32.mrb[3].mxu1 }
  0xeb   : > { %v677_v37 = vmax.f32 %v645_v27, 0.0  ;;  %v659_v38 = vadd.f32 %v1309_v19, %v620_v28  ;;  %v646_v39 = vadd.f32 %v1309_v19, %v607_v29  ;;  %v621_v40 = vmul.f32 %v1304_v17, %v537_v36 }
  0xec   : > { %v693_v41 = vmax.f32 %v661_v32, 0.0  ;;  %v675_v42 = vmax.f32 %v643_v33, 0.0  ;;  %v662_v43 = vadd.f32 %v1309_v19, %v623_v34  ;;  %v644_v44 = vadd.f32 %v1309_v19, %v605_v35 }
  0xed   : > { %v1065_v45 = vpack.c.bf16 %v677_v37, %v677_v37  ;;  %v691_v46 = vmax.f32 %v659_v38, 0.0  ;;  %v678_v47 = vmax.f32 %v646_v39, 0.0  ;;  %v660_v48 = vadd.f32 %v1309_v19, %v621_v40 }
  0xee   : > { %v1081_v49 = vpack.c.bf16 %v693_v41, %v693_v41  ;;  %v1063_v50 = vpack.c.bf16 %v675_v42, %v675_v42  ;;  %v694_v51 = vmax.f32 %v662_v43, 0.0  ;;  %v676_v52 = vmax.f32 %v644_v44, 0.0  ;;  %v1120_v53 = vpop.f32.mrb[4].mxu0 }
  0xef   : > { %838 = vst.msk [vmem:[%s1329_s6 + $0x8] sm:$0xf] %vm835_vm1, %v1065_v45  ;;  %v1079_v54 = vpack.c.bf16 %v691_v46, %v691_v46  ;;  %v1066_v55 = vpack.c.bf16 %v678_v47, %v678_v47  ;;  %v692_v56 = vmax.f32 %v660_v48, 0.0  ;;  %v610_v57 = vmul.f32 %v1120_v53, %v1304_v17  ;;  %v1136_v58 = vpop.f32.mrb[4].mxu1  ;;  %v486_v59 = vpop.f32.mrb[5].mxu0 }
  0xf0   : > { %854 = vst.msk [vmem:[%s1329_s6 + $0x48] sm:$0xf] %vm835_vm1, %v1081_v49  ;;  %836 = vst.msk [vmem:[%s1329_s6] sm:$0xf] %vm835_vm1, %v1063_v50  ;;  %v1082_v60 = vpack.c.bf16 %v694_v51, %v694_v51  ;;  %v1064_v61 = vpack.c.bf16 %v676_v52, %v676_v52  ;;  %v626_v62 = vmul.f32 %v1136_v58, %v1304_v17  ;;  %v550_v0 = vpop.f32.mrb[5].mxu1  ;;  %v1121_v1 = vpop.f32.mrb[6].mxu0 }
  0xf1   : > { %v608_v63 = vmul.f32 %v1304_v17, %v486_v59  ;;  %852 = vst.msk [vmem:[%s1329_s6 + $0x40] sm:$0xf] %vm835_vm1, %v1079_v54  ;;  %839 = vst.msk [vmem:[%s1329_s6 + $0xc] sm:$0xf] %vm835_vm1, %v1066_v55  ;;  %v1080_v2 = vpack.c.bf16 %v692_v56, %v692_v56  ;;  %v649_v3 = vadd.f32 %v1309_v19, %v610_v57  ;;  %v1137_v6 = vpop.f32.mrb[6].mxu1  ;;  %v489_v7 = vpop.f32.mrb[7].mxu0 }
  0xf2   : > { %v624_v4 = vmul.f32 %v1304_v17, %v550_v0  ;;  %v611_v5 = vmul.f32 %v1121_v1, %v1304_v17  ;;  %855 = vst.msk [vmem:[%s1329_s6 + $0x4c] sm:$0xf] %vm835_vm1, %v1082_v60  ;;  %837 = vst.msk [vmem:[%s1329_s6 + $0x4] sm:$0xf] %vm835_vm1, %v1064_v61  ;;  %v665_v8 = vadd.f32 %v1309_v19, %v626_v62  ;;  %v553_v12 = vpop.f32.mrb[7].mxu1 }
  0xf3   : > { %v647_v9 = vadd.f32 %v1309_v19, %v608_v63  ;;  %v627_v10 = vmul.f32 %v1137_v6, %v1304_v17  ;;  %v609_v11 = vmul.f32 %v1304_v17, %v489_v7  ;;  %853 = vst.msk [vmem:[%s1329_s6 + $0x44] sm:$0xf] %vm835_vm1, %v1080_v2  ;;  %v681_v13 = vmax.f32 %v649_v3, 0.0 }
  0xf4   : > { %v663_v14 = vadd.f32 %v1309_v19, %v624_v4  ;;  %v650_v15 = vadd.f32 %v1309_v19, %v611_v5  ;;  %v625_v16 = vmul.f32 %v1304_v17, %v553_v12  ;;  %v697_v18 = vmax.f32 %v665_v8, 0.0 }
  0xf5   : > { %v679_v20 = vmax.f32 %v647_v9, 0.0  ;;  %v666_v21 = vadd.f32 %v1309_v19, %v627_v10  ;;  %v648_v22 = vadd.f32 %v1309_v19, %v609_v11  ;;  %v1069_v23 = vpack.c.bf16 %v681_v13, %v681_v13 }
  0xf6   : > { %v695_v24 = vmax.f32 %v663_v14, 0.0  ;;  %v682_v25 = vmax.f32 %v650_v15, 0.0  ;;  %v664_v26 = vadd.f32 %v1309_v19, %v625_v16  ;;  %v1085_v27 = vpack.c.bf16 %v697_v18, %v697_v18  ;;  %v1124_v31 = vpop.f32.mrb[8].mxu0 }
  0xf7   : > { %v1067_v28 = vpack.c.bf16 %v679_v20, %v679_v20  ;;  %v698_v29 = vmax.f32 %v666_v21, 0.0  ;;  %v680_v30 = vmax.f32 %v648_v22, 0.0  ;;  %842 = vst.msk [vmem:[%s1329_s6 + $0x18] sm:$0xf] %vm835_vm1, %v1069_v23  ;;  %v614_v35 = vmul.f32 %v1124_v31, %v1304_v17  ;;  %v1140_v36 = vpop.f32.mrb[8].mxu1  ;;  %v502_v37 = vpop.f32.mrb[9].mxu0 }
  0xf8   : > { %v1083_v32 = vpack.c.bf16 %v695_v24, %v695_v24  ;;  %v1070_v33 = vpack.c.bf16 %v682_v25, %v682_v25  ;;  %v696_v34 = vmax.f32 %v664_v26, 0.0  ;;  %858 = vst.msk [vmem:[%s1329_s6 + $0x58] sm:$0xf] %vm835_vm1, %v1085_v27  ;;  %v630_v40 = vmul.f32 %v1140_v36, %v1304_v17  ;;  %v566_v42 = vpop.f32.mrb[9].mxu1  ;;  %v1125_v43 = vpop.f32.mrb[10].mxu0 }
  0xf9   : > { %840 = vst.msk [vmem:[%s1329_s6 + $0x10] sm:$0xf] %vm835_vm1, %v1067_v28  ;;  %v1086_v38 = vpack.c.bf16 %v698_v29, %v698_v29  ;;  %v1068_v39 = vpack.c.bf16 %v680_v30, %v680_v30  ;;  %v612_v41 = vmul.f32 %v1304_v17, %v502_v37  ;;  %v653_v45 = vadd.f32 %v1309_v19, %v614_v35  ;;  %v1141_v48 = vpop.f32.mrb[10].mxu1  ;;  %v505_v49 = vpop.f32.mrb[11].mxu0 }
  0xfa   : > { %856 = vst.msk [vmem:[%s1329_s6 + $0x50] sm:$0xf] %vm835_vm1, %v1083_v32  ;;  %843 = vst.msk [vmem:[%s1329_s6 + $0x1c] sm:$0xf] %vm835_vm1, %v1070_v33  ;;  %v1084_v44 = vpack.c.bf16 %v696_v34, %v696_v34  ;;  %v628_v46 = vmul.f32 %v1304_v17, %v566_v42  ;;  %v615_v47 = vmul.f32 %v1125_v43, %v1304_v17  ;;  %v569_v54 = vpop.f32.mrb[11].mxu1 }
  0xfb   : > { %859 = vst.msk [vmem:[%s1329_s6 + $0x5c] sm:$0xf] %vm835_vm1, %v1086_v38  ;;  %841 = vst.msk [vmem:[%s1329_s6 + $0x14] sm:$0xf] %vm835_vm1, %v1068_v39  ;;  %v669_v50 = vadd.f32 %v1309_v19, %v630_v40  ;;  %v651_v51 = vadd.f32 %v1309_v19, %v612_v41  ;;  %v631_v52 = vmul.f32 %v1141_v48, %v1304_v17  ;;  %v685_v55 = vmax.f32 %v653_v45, 0.0 }
  0xfc   : > { %v613_v53 = vmul.f32 %v1304_v17, %v505_v49  ;;  %857 = vst.msk [vmem:[%s1329_s6 + $0x54] sm:$0xf] %vm835_vm1, %v1084_v44  ;;  %v667_v56 = vadd.f32 %v1309_v19, %v628_v46  ;;  %v654_v57 = vadd.f32 %v1309_v19, %v615_v47  ;;  %v629_v58 = vmul.f32 %v1304_v17, %v569_v54 }
  0xfd   : > { %v701_v59 = vmax.f32 %v669_v50, 0.0  ;;  %v683_v60 = vmax.f32 %v651_v51, 0.0  ;;  %v670_v61 = vadd.f32 %v1309_v19, %v631_v52  ;;  %v1073_v63 = vpack.c.bf16 %v685_v55, %v685_v55 }
  0xfe   : > { %v652_v62 = vadd.f32 %v1309_v19, %v613_v53  ;;  %v699_v0 = vmax.f32 %v667_v56, 0.0  ;;  %v686_v1 = vmax.f32 %v654_v57, 0.0  ;;  %v668_v2 = vadd.f32 %v1309_v19, %v629_v58  ;;  %v1128_v7 = vpop.f32.mrb[12].mxu0 }
  0xff   : > { %v1089_v3 = vpack.c.bf16 %v701_v59, %v701_v59  ;;  %v1071_v4 = vpack.c.bf16 %v683_v60, %v683_v60  ;;  %v702_v5 = vmax.f32 %v670_v61, 0.0  ;;  %846 = vst.msk [vmem:[%s1329_s6 + $0x28] sm:$0xf] %vm835_vm1, %v1073_v63  ;;  %v618_v11 = vmul.f32 %v1128_v7, %v1304_v17  ;;  %v1144_v12 = vpop.f32.mrb[12].mxu1  ;;  %v518_v13 = vpop.f32.mrb[13].mxu0 }
 0x100   : > { %v684_v6 = vmax.f32 %v652_v62, 0.0  ;;  %v1087_v8 = vpack.c.bf16 %v699_v0, %v699_v0  ;;  %v1074_v9 = vpack.c.bf16 %v686_v1, %v686_v1  ;;  %v700_v10 = vmax.f32 %v668_v2, 0.0  ;;  %v582_v20 = vpop.f32.mrb[13].mxu1  ;;  %v1129_v21 = vpop.f32.mrb[14].mxu0 }
 0x101   : > { %862 = vst.msk [vmem:[%s1329_s6 + $0x68] sm:$0xf] %vm835_vm1, %v1089_v3  ;;  %844 = vst.msk [vmem:[%s1329_s6 + $0x20] sm:$0xf] %vm835_vm1, %v1071_v4  ;;  %v1090_v14 = vpack.c.bf16 %v702_v5, %v702_v5  ;;  %v634_v16 = vmul.f32 %v1144_v12, %v1304_v17  ;;  %v616_v18 = vmul.f32 %v1304_v17, %v518_v13  ;;  %v1145_v26 = vpop.f32.mrb[14].mxu1  ;;  %v521_v27 = vpop.f32.mrb[15].mxu0 }
 0x102   : > { %v1072_v15 = vpack.c.bf16 %v684_v6, %v684_v6  ;;  %860 = vst.msk [vmem:[%s1329_s6 + $0x60] sm:$0xf] %vm835_vm1, %v1087_v8  ;;  %847 = vst.msk [vmem:[%s1329_s6 + $0x2c] sm:$0xf] %vm835_vm1, %v1074_v9  ;;  %v1088_v22 = vpack.c.bf16 %v700_v10, %v700_v10  ;;  %v657_v23 = vadd.f32 %v1309_v19, %v618_v11  ;;  %v585_v32 = vpop.f32.mrb[15].mxu1 }
 0x103   : > { %v632_v24 = vmul.f32 %v1304_v17, %v582_v20  ;;  %v619_v25 = vmul.f32 %v1129_v21, %v1304_v17  ;;  %863 = vst.msk [vmem:[%s1329_s6 + $0x6c] sm:$0xf] %vm835_vm1, %v1090_v14  ;;  %v673_v28 = vadd.f32 %v1309_v19, %v634_v16  ;;  %v655_v29 = vadd.f32 %v1309_v19, %v616_v18 }
 0x104   : > { %845 = vst.msk [vmem:[%s1329_s6 + $0x24] sm:$0xf] %vm835_vm1, %v1072_v15  ;;  %v635_v30 = vmul.f32 %v1145_v26, %v1304_v17  ;;  %v617_v31 = vmul.f32 %v1304_v17, %v521_v27  ;;  %861 = vst.msk [vmem:[%s1329_s6 + $0x64] sm:$0xf] %vm835_vm1, %v1088_v22  ;;  %v689_v33 = vmax.f32 %v657_v23, 0.0  ;;  %v633_v36 = vmul.f32 %v1304_v17, %v585_v32 }
 0x105   : > { %v671_v34 = vadd.f32 %v1309_v19, %v632_v24  ;;  %v658_v35 = vadd.f32 %v1309_v19, %v619_v25  ;;  %v705_v37 = vmax.f32 %v673_v28, 0.0  ;;  %v687_v38 = vmax.f32 %v655_v29, 0.0 }
 0x106   : > { %v674_v39 = vadd.f32 %v1309_v19, %v635_v30  ;;  %v656_v40 = vadd.f32 %v1309_v19, %v617_v31  ;;  %v1077_v41 = vpack.c.bf16 %v689_v33, %v689_v33  ;;  %v672_v44 = vadd.f32 %v1309_v19, %v633_v36 }
 0x107   : > { %v703_v42 = vmax.f32 %v671_v34, 0.0  ;;  %v690_v43 = vmax.f32 %v658_v35, 0.0  ;;  %v1093_v45 = vpack.c.bf16 %v705_v37, %v705_v37  ;;  %v1075_v46 = vpack.c.bf16 %v687_v38, %v687_v38 }
 0x108   : > { %v706_v17 = vmax.f32 %v674_v39, 0.0  ;;  %v688_v47 = vmax.f32 %v656_v40, 0.0  ;;  %850 = vst.msk [vmem:[%s1329_s6 + $0x38] sm:$0xf] %vm835_vm1, %v1077_v41  ;;  %v704_v50 = vmax.f32 %v672_v44, 0.0 }
 0x109   : > { %v1091_v48 = vpack.c.bf16 %v703_v42, %v703_v42  ;;  %v1078_v49 = vpack.c.bf16 %v690_v43, %v690_v43  ;;  %866 = vst.msk [vmem:[%s1329_s6 + $0x78] sm:$0xf] %vm835_vm1, %v1093_v45  ;;  %848 = vst.msk [vmem:[%s1329_s6 + $0x30] sm:$0xf] %vm835_vm1, %v1075_v46 }
 0x10a   : > { %v1094_v51 = vpack.c.bf16 %v706_v17, %v706_v17  ;;  %v1076_v52 = vpack.c.bf16 %v688_v47, %v688_v47  ;;  %v1092_v19 = vpack.c.bf16 %v704_v50, %v704_v50 }
 0x10b   : > { %864 = vst.msk [vmem:[%s1329_s6 + $0x70] sm:$0xf] %vm835_vm1, %v1091_v48  ;;  %851 = vst.msk [vmem:[%s1329_s6 + $0x3c] sm:$0xf] %vm835_vm1, %v1078_v49 }
 0x10c   : > { %867 = vst.msk [vmem:[%s1329_s6 + $0x7c] sm:$0xf] %vm835_vm1, %v1094_v51  ;;  %849 = vst.msk [vmem:[%s1329_s6 + $0x34] sm:$0xf] %vm835_vm1, %v1076_v52 }
 0x10d   : > { %865 = vst.msk [vmem:[%s1329_s6 + $0x74] sm:$0xf] %vm835_vm1, %v1092_v19 }
 0x10e PF: > { %s14_s17 = sadd.s32 1, %s1211_s17   ;;  %s1460_s15 = smov %s1207_s16 }
 0x10f   : > { %p11_p5 = scmp.ge.s32.totalorder %s14_s17, 4   ;;  %s1461_s16 = smov %s1463_s18 }
 0x111   :  { %13 = sbr.rel (!%p11_p5) target bundleno = 2 (0x2), region = 75 }

// kernel: bottleneck_forward.6
= control target key start
LH: loop header
LB: loop body
LE: loop exit
PB: predicated region body
PF: predicated region fallthrough
CT: control target
= control target key end

     0   :  { %vm82_vm0 = vcmask 130048   ;;  %vm314_vm1 = vcmask 257024   ;;  %s590_s1 = inlined_call_operand.vmem [shape: bf16[16,32], index: 1, kind: input, shape index: {}]   ;;  %s591_s0 = inlined_call_operand.vmem [shape: bf16[128,16], index: 0, kind: input, shape index: {}]   ;;  %s592_s2 = inlined_call_operand.vmem [shape: f32[1,32], index: 2, kind: input, shape index: {}]   ;;  %s593_s3 = inlined_call_operand.vmem [shape: f32[1,32], index: 3, kind: input, shape index: {}]   ;;  %s594_s4 = inlined_call_operand.vmem [shape: bf16[128,32], index: 4, kind: output, shape index: {}]  }
   0x1   :  { %v415_v0 = vld [vmem:[%s590_s1] sm:$0xff]   ;;  %v418_v3 = vld [vmem:[%s591_s0 + $0x8] sm:$0xff]   ;;  %v420_v5 = vld [vmem:[%s591_s0 + $0x10] sm:$0xff]  }
   0x2   :  { %v416_v1 = vld [vmem:[%s591_s0] sm:$0xff]   ;;  %395 = vmatprep.subr.bf16.mxu0 %v415_v0  ;;  %413 = vmatprep.subr.bf16.mxu1 %v415_v0  ;;  %v419_v4 = vld [vmem:[%s591_s0 + $0x28] sm:$0xff]   ;;  %v421_v6 = vld [vmem:[%s591_s0 + $0x30] sm:$0xff]  }
   0x3   :  { %v417_v2 = vld [vmem:[%s591_s0 + $0x20] sm:$0xff]   ;;  %396 = vmatpush3.bf16.msra.mxu0 %v415_v0  ;;  %414 = vmatpush3.bf16.msra.mxu1 %v415_v0  ;;  %v422_v7 = vld [vmem:[%s591_s0 + $0x18] sm:$0xff]  }
   0x4   :  { %397 = vmatprep.mubr.msk.bf16.mxu0 %vm82_vm0, %v416_v1  ;;  %405 = vmatprep.mubr.msk.bf16.mxu1 %vm82_vm0, %v417_v2  ;;  %v423_v8 = vld [vmem:[%s591_s0 + $0x38] sm:$0xff]   ;;  %v487_v9 = vld [vmem:[%s592_s2] ss:$0 sm:$0xff] }
   0x5   :  { %v492_v11 = vld [vmem:[%s593_s3] ss:$0 sm:$0xff] }
   0x6   :  { %398 = vmatmul.mubr.msk.bf16.vlgmr.msra.gmra.mrb[0].mxu0 %vm82_vm0, %v418_v3  ;;  %406 = vmatmul.mubr.msk.bf16.vlgmr.msra.gmra.mrb[0].mxu1 %vm82_vm0, %v419_v4 }
   0x7   :  { %401 = vmatprep.mubr.msk.bf16.mxu0 %vm82_vm0, %v420_v5  ;;  %409 = vmatprep.mubr.msk.bf16.mxu1 %vm82_vm0, %v421_v6 }
   0xe   :  { %402 = vmatmul.mubr.msk.bf16.gmra.mrb[4].mxu0 %vm82_vm0, %v422_v7  ;;  %410 = vmatmul.mubr.msk.bf16.gmra.mrb[4].mxu1 %vm82_vm0, %v423_v8 }
  0xd9   :  { %v399_v10 = vpop.f32.mrb[0].mxu0  ;;  %v407_v12 = vpop.f32.mrb[0].mxu1 }
  0xda   :  { %v213_v13 = vmul.f32 %v399_v10, %v487_v9  ;;  %v221_v14 = vmul.f32 %v407_v12, %v487_v9  ;;  %v141_v15 = vpop.f32.mrb[1].mxu0  ;;  %v173_v16 = vpop.f32.mrb[1].mxu1 }
  0xdb   :  { %v211_v17 = vmul.f32 %v487_v9, %v141_v15  ;;  %v219_v18 = vmul.f32 %v487_v9, %v173_v16  ;;  %v400_v19 = vpop.f32.mrb[2].mxu0  ;;  %v408_v20 = vpop.f32.mrb[2].mxu1 }
  0xdc   :  { %v236_v21 = vadd.f32 %v492_v11, %v213_v13  ;;  %v244_v22 = vadd.f32 %v492_v11, %v221_v14  ;;  %v214_v23 = vmul.f32 %v400_v19, %v487_v9  ;;  %v222_v24 = vmul.f32 %v408_v20, %v487_v9  ;;  %v144_v25 = vpop.f32.mrb[3].mxu0  ;;  %v176_v26 = vpop.f32.mrb[3].mxu1 }
  0xdd   :  { %v234_v27 = vadd.f32 %v492_v11, %v211_v17  ;;  %v242_v28 = vadd.f32 %v492_v11, %v219_v18  ;;  %v212_v29 = vmul.f32 %v487_v9, %v144_v25  ;;  %v220_v30 = vmul.f32 %v487_v9, %v176_v26 }
  0xde   :  { %v372_v31 = vpack.c.bf16 %v236_v21, %v236_v21  ;;  %v380_v32 = vpack.c.bf16 %v244_v22, %v244_v22  ;;  %v237_v33 = vadd.f32 %v492_v11, %v214_v23  ;;  %v245_v34 = vadd.f32 %v492_v11, %v222_v24 }
  0xdf   :  { %v370_v35 = vpack.c.bf16 %v234_v27, %v234_v27  ;;  %v378_v36 = vpack.c.bf16 %v242_v28, %v242_v28  ;;  %v235_v37 = vadd.f32 %v492_v11, %v212_v29  ;;  %v243_v38 = vadd.f32 %v492_v11, %v220_v30 }
  0xe0   :  { %317 = vst.msk [vmem:[%s594_s4 + $0x8] sm:$0xf] %vm314_vm1, %v372_v31  ;;  %325 = vst.msk [vmem:[%s594_s4 + $0x28] sm:$0xf] %vm314_vm1, %v380_v32  ;;  %v373_v39 = vpack.c.bf16 %v237_v33, %v237_v33  ;;  %v381_v40 = vpack.c.bf16 %v245_v34, %v245_v34 }
  0xe1   :  { %315 = vst.msk [vmem:[%s594_s4] sm:$0xf] %vm314_vm1, %v370_v35  ;;  %323 = vst.msk [vmem:[%s594_s4 + $0x20] sm:$0xf] %vm314_vm1, %v378_v36  ;;  %v371_v41 = vpack.c.bf16 %v235_v37, %v235_v37  ;;  %v379_v42 = vpack.c.bf16 %v243_v38, %v243_v38  ;;  %v403_v43 = vpop.f32.mrb[4].mxu0  ;;  %v411_v44 = vpop.f32.mrb[4].mxu1 }
  0xe2   :  { %318 = vst.msk [vmem:[%s594_s4 + $0xc] sm:$0xf] %vm314_vm1, %v373_v39  ;;  %326 = vst.msk [vmem:[%s594_s4 + $0x2c] sm:$0xf] %vm314_vm1, %v381_v40  ;;  %v217_v45 = vmul.f32 %v403_v43, %v487_v9  ;;  %v225_v46 = vmul.f32 %v411_v44, %v487_v9  ;;  %v157_v47 = vpop.f32.mrb[5].mxu0  ;;  %v189_v48 = vpop.f32.mrb[5].mxu1 }
  0xe3   :  { %316 = vst.msk [vmem:[%s594_s4 + $0x4] sm:$0xf] %vm314_vm1, %v371_v41  ;;  %324 = vst.msk [vmem:[%s594_s4 + $0x24] sm:$0xf] %vm314_vm1, %v379_v42  ;;  %v215_v49 = vmul.f32 %v487_v9, %v157_v47  ;;  %v223_v50 = vmul.f32 %v487_v9, %v189_v48  ;;  %v404_v51 = vpop.f32.mrb[6].mxu0  ;;  %v412_v52 = vpop.f32.mrb[6].mxu1 }
  0xe4   :  { %v240_v53 = vadd.f32 %v492_v11, %v217_v45  ;;  %v248_v54 = vadd.f32 %v492_v11, %v225_v46  ;;  %v218_v55 = vmul.f32 %v404_v51, %v487_v9  ;;  %v226_v56 = vmul.f32 %v412_v52, %v487_v9  ;;  %v160_v57 = vpop.f32.mrb[7].mxu0  ;;  %v192_v58 = vpop.f32.mrb[7].mxu1 }
  0xe5   :  { %v238_v59 = vadd.f32 %v492_v11, %v215_v49  ;;  %v246_v60 = vadd.f32 %v492_v11, %v223_v50  ;;  %v216_v61 = vmul.f32 %v487_v9, %v160_v57  ;;  %v224_v62 = vmul.f32 %v487_v9, %v192_v58 }
  0xe6   :  { %v376_v63 = vpack.c.bf16 %v240_v53, %v240_v53  ;;  %v384_v0 = vpack.c.bf16 %v248_v54, %v248_v54  ;;  %v241_v1 = vadd.f32 %v492_v11, %v218_v55  ;;  %v249_v2 = vadd.f32 %v492_v11, %v226_v56 }
  0xe7   :  { %v374_v3 = vpack.c.bf16 %v238_v59, %v238_v59  ;;  %v382_v4 = vpack.c.bf16 %v246_v60, %v246_v60  ;;  %v239_v5 = vadd.f32 %v492_v11, %v216_v61  ;;  %v247_v6 = vadd.f32 %v492_v11, %v224_v62 }
  0xe8   :  { %321 = vst.msk [vmem:[%s594_s4 + $0x18] sm:$0xf] %vm314_vm1, %v376_v63  ;;  %329 = vst.msk [vmem:[%s594_s4 + $0x38] sm:$0xf] %vm314_vm1, %v384_v0  ;;  %v377_v7 = vpack.c.bf16 %v241_v1, %v241_v1  ;;  %v385_v8 = vpack.c.bf16 %v249_v2, %v249_v2 }
  0xe9   :  { %319 = vst.msk [vmem:[%s594_s4 + $0x10] sm:$0xf] %vm314_vm1, %v374_v3  ;;  %327 = vst.msk [vmem:[%s594_s4 + $0x30] sm:$0xf] %vm314_vm1, %v382_v4  ;;  %v375_v9 = vpack.c.bf16 %v239_v5, %v239_v5  ;;  %v383_v10 = vpack.c.bf16 %v247_v6, %v247_v6 }
  0xea   :  { %322 = vst.msk [vmem:[%s594_s4 + $0x1c] sm:$0xf] %vm314_vm1, %v377_v7  ;;  %330 = vst.msk [vmem:[%s594_s4 + $0x3c] sm:$0xf] %vm314_vm1, %v385_v8 }
  0xeb   :  { %320 = vst.msk [vmem:[%s594_s4 + $0x14] sm:$0xf] %vm314_vm1, %v375_v9  ;;  %328 = vst.msk [vmem:[%s594_s4 + $0x34] sm:$0xf] %vm314_vm1, %v383_v10 }

// kernel: bottleneck_forward.7
= control target key start
LH: loop header
LB: loop body
LE: loop exit
PB: predicated region body
PF: predicated region fallthrough
CT: control target
= control target key end

     0   :  { %vm104_vm0 = vcmask 1043456   ;;  %vm79_vm1 = vcmask 64512   ;;  %s669_s0 = inlined_call_operand.vmem [shape: bf16[128,8], index: 0, kind: input, shape index: {}]   ;;  %s670_s1 = inlined_call_operand.vmem [shape: bf16[8,32], index: 1, kind: input, shape index: {}]   ;;  %s671_s2 = inlined_call_operand.vmem [shape: f32[1,32], index: 2, kind: input, shape index: {}]   ;;  %s672_s3 = inlined_call_operand.vmem [shape: f32[1,32], index: 3, kind: input, shape index: {}]   ;;  %s673_s4 = inlined_call_operand.vmem [shape: bf16[128,32], index: 4, kind: input, shape index: {}]   ;;  %s674_s5 = inlined_call_operand.hbm [shape: f32[128,32], index: 5, kind: output, shape index: {}]  }
   0x1   :  { %v38_v0 = vld [vmem:[%s670_s1] sm:$0xf]  ;;  %v441_v4 = vld [vmem:[%s669_s0 + $0x8] sm:$0xff]   ;;  %v443_v6 = vld [vmem:[%s669_s0 + $0x10] sm:$0xff]  }
   0x2   :  { %v439_v1 = vld [vmem:[%s669_s0] sm:$0xff]   ;;  %434 = vmatprep.subr.msk.bf16.mxu0 %vm104_vm0, %v38_v0  ;;  %435 = vmatprep.subr.msk.bf16.mxu1 %vm104_vm0, %v38_v0  ;;  %v106_v2 = vsel %vm104_vm0, %v38_v0, 0  ;;  %v442_v5 = vld [vmem:[%s669_s0 + $0x28] sm:$0xff]   ;;  %v444_v7 = vld [vmem:[%s669_s0 + $0x30] sm:$0xff]  }
   0x3   :  { %415 = vmatpush3.bf16.msra.mxu0 %v106_v2  ;;  %433 = vmatpush3.bf16.msra.mxu1 %v106_v2  ;;  %v440_v3 = vld [vmem:[%s669_s0 + $0x20] sm:$0xff]  }
   0x4   :  { %416 = vmatprep.mubr.msk.bf16.mxu0 %vm79_vm1, %v439_v1  ;;  %424 = vmatprep.mubr.msk.bf16.mxu1 %vm79_vm1, %v440_v3 }
   0x6   :  { %417 = vmatmul.mubr.msk.bf16.vlgmr.msra.gmra.mrb[0].mxu0 %vm79_vm1, %v441_v4  ;;  %425 = vmatmul.mubr.msk.bf16.vlgmr.msra.gmra.mrb[0].mxu1 %vm79_vm1, %v442_v5 }
   0x7   :  { %420 = vmatprep.mubr.msk.bf16.mxu0 %vm79_vm1, %v443_v6  ;;  %428 = vmatprep.mubr.msk.bf16.mxu1 %vm79_vm1, %v444_v7 }
   0x8   :  { %10 = vsyncpa [#allocation3], 0  ;;  %v445_v8 = vld [vmem:[%s669_s0 + $0x18] sm:$0xff]   ;;  %v398_v10 = vld [vmem:[%s673_s4 + $0x8] sm:$0xff]   ;;  %vm315_vm2 = vcmask 261120  }
   0x9   :  { %v446_v9 = vld [vmem:[%s669_s0 + $0x38] sm:$0xff]   ;;  %v402_v11 = vld [vmem:[%s673_s4 + $0x28] sm:$0xff]   ;;  %v367_v12 = vld [vmem:[%s673_s4] sm:$0xff]   ;;  %v372_v17 = vunpack.c.l.bf16 %v398_v10  ;;  %v373_v23 = vunpack.c.h.bf16 %v398_v10 }
   0xa   :  { %v551_v13 = vld [vmem:[%s673_s4 + $0x20] sm:$0xff]   ;;  %v556_v14 = vld [vmem:[%s673_s4 + $0x18] sm:$0xff]   ;;  %v388_v18 = vunpack.c.l.bf16 %v402_v11  ;;  %v368_v19 = vunpack.c.l.bf16 %v367_v12  ;;  %v571_v20 = vld [vmem:[%s673_s4 + $0x10] sm:$0xff]   ;;  %v389_v24 = vunpack.c.h.bf16 %v402_v11  ;;  %v369_v27 = vunpack.c.h.bf16 %v367_v12 }
   0xb   :  { %v561_v15 = vld [vmem:[%s673_s4 + $0x38] sm:$0xff]   ;;  %v566_v16 = vld [vmem:[%s671_s2] ss:$0 sm:$0xff]  ;;  %v576_v21 = vld [vmem:[%s673_s4 + $0x30] sm:$0xff]   ;;  %v384_v22 = vunpack.c.l.bf16 %v551_v13  ;;  %v385_v28 = vunpack.c.h.bf16 %v551_v13  ;;  %v380_v29 = vunpack.c.l.bf16 %v556_v14  ;;  %v376_v34 = vunpack.c.l.bf16 %v571_v20 }
   0xc   :  { %v582_v26 = vld [vmem:[%s672_s3] ss:$0 sm:$0xff]  ;;  %v396_v30 = vunpack.c.l.bf16 %v561_v15  ;;  %v392_v35 = vunpack.c.l.bf16 %v576_v21  ;;  %v381_v36 = vunpack.c.h.bf16 %v556_v14  ;;  %v397_v41 = vunpack.c.h.bf16 %v561_v15  ;;  %s471_s3 = smov [#allocation2]  }
   0xd   :  { %v377_v42 = vunpack.c.h.bf16 %v571_v20  ;;  %v393_v48 = vunpack.c.h.bf16 %v576_v21  ;;  %s337_s4 = sshll.u32 %s471_s3, 4  ;;  %s338_s4 = int_to_ptr.vmem [resolvable:$true] %s337_s4 }
   0xe   :  { %421 = vmatmul.mubr.msk.bf16.gmra.mrb[4].mxu0 %vm79_vm1, %v445_v8  ;;  %429 = vmatmul.mubr.msk.bf16.gmra.mrb[4].mxu1 %vm79_vm1, %v446_v9  ;;  %s447_s27 = scalar_lea.vmem %s338_s4, 2048  ;;  %p452_p1 = scmp.lt.s32.totalorder %s338_s4, %s338_s4 }
   0xf   :  { %p448_p0 = scmp.ne.s32.totalorder %s338_s4, %s447_s27  ;;  %p453_p2 = scmp.lt.s32.totalorder %s447_s27, %s447_s27 }
  0x11   :  { %p454_p3 = por %p453_p2, %p452_p1 }
  0x13   :  { %p455_p4 = pnand %p454_p3, %p448_p0 }
  0xd9   :  { %v418_v25 = vpop.f32.mrb[0].mxu0  ;;  %v426_v32 = vpop.f32.mrb[0].mxu1 }
  0xda   :  { %v214_v31 = vmul.f32 %v418_v25, %v566_v16  ;;  %v142_v33 = vpop.f32.mrb[1].mxu0  ;;  %v222_v37 = vmul.f32 %v426_v32, %v566_v16  ;;  %v174_v39 = vpop.f32.mrb[1].mxu1 }
  0xdb   :  { %v212_v38 = vmul.f32 %v566_v16, %v142_v33  ;;  %v419_v40 = vpop.f32.mrb[2].mxu0  ;;  %v220_v44 = vmul.f32 %v566_v16, %v174_v39  ;;  %v427_v46 = vpop.f32.mrb[2].mxu1 }
  0xdc   :  { %v237_v43 = vadd.f32 %v582_v26, %v214_v31  ;;  %v215_v45 = vmul.f32 %v419_v40, %v566_v16  ;;  %v145_v47 = vpop.f32.mrb[3].mxu0  ;;  %v245_v49 = vadd.f32 %v582_v26, %v222_v37  ;;  %v223_v51 = vmul.f32 %v427_v46, %v566_v16  ;;  %v177_v53 = vpop.f32.mrb[3].mxu1 }
  0xdd   :  { %v235_v50 = vadd.f32 %v582_v26, %v212_v38  ;;  %v213_v52 = vmul.f32 %v566_v16, %v145_v47  ;;  %v243_v55 = vadd.f32 %v582_v26, %v220_v44  ;;  %v221_v57 = vmul.f32 %v566_v16, %v177_v53 }
  0xde   :  { %v285_v54 = vadd.f32 %v372_v17, %v237_v43  ;;  %v238_v56 = vadd.f32 %v582_v26, %v215_v45  ;;  %v293_v58 = vadd.f32 %v388_v18, %v245_v49  ;;  %v246_v60 = vadd.f32 %v582_v26, %v223_v51 }
  0xdf   :  { %v283_v59 = vadd.f32 %v368_v19, %v235_v50  ;;  %v236_v61 = vadd.f32 %v582_v26, %v213_v52  ;;  %v291_v63 = vadd.f32 %v384_v22, %v243_v55  ;;  %v244_v1 = vadd.f32 %v582_v26, %v221_v57 }
  0xe0   :  { %v301_v62 = vmax.f32 %v285_v54, 0.0  ;;  %v286_v0 = vadd.f32 %v373_v23, %v238_v56  ;;  %v309_v2 = vmax.f32 %v293_v58, 0.0  ;;  %v294_v4 = vadd.f32 %v389_v24, %v246_v60 }
  0xe1   :  { %v299_v3 = vmax.f32 %v283_v59, 0.0  ;;  %v284_v5 = vadd.f32 %v369_v27, %v236_v61  ;;  %v422_v6 = vpop.f32.mrb[4].mxu0  ;;  %v307_v7 = vmax.f32 %v291_v63, 0.0  ;;  %v292_v9 = vadd.f32 %v385_v28, %v244_v1  ;;  %v430_v11 = vpop.f32.mrb[4].mxu1 }
  0xe2   :  { %318 = vst.msk [vmem:[#allocation2 + $0x10] sm:$0xff] %vm315_vm2, %v301_v62  ;;  %v302_v8 = vmax.f32 %v286_v0, 0.0  ;;  %v218_v10 = vmul.f32 %v422_v6, %v566_v16  ;;  %v158_v12 = vpop.f32.mrb[5].mxu0  ;;  %326 = vst.msk [vmem:[#allocation2 + $0x50] sm:$0xff] %vm315_vm2, %v309_v2  ;;  %v310_v13 = vmax.f32 %v294_v4, 0.0  ;;  %v226_v18 = vmul.f32 %v430_v11, %v566_v16  ;;  %v190_v22 = vpop.f32.mrb[5].mxu1 }
  0xe3   :  { %316 = vst.msk [vmem:[#allocation2] sm:$0xff] %vm315_vm2, %v299_v3  ;;  %v300_v17 = vmax.f32 %v284_v5, 0.0  ;;  %v216_v19 = vmul.f32 %v566_v16, %v158_v12  ;;  %v423_v23 = vpop.f32.mrb[6].mxu0  ;;  %324 = vst.msk [vmem:[#allocation2 + $0x40] sm:$0xff] %vm315_vm2, %v307_v7  ;;  %v308_v24 = vmax.f32 %v292_v9, 0.0  ;;  %v224_v27 = vmul.f32 %v566_v16, %v190_v22  ;;  %v431_v31 = vpop.f32.mrb[6].mxu1 }
  0xe4   :  { %319 = vst.msk [vmem:[#allocation2 + $0x18] sm:$0xff] %vm315_vm2, %v302_v8  ;;  %v241_v25 = vadd.f32 %v582_v26, %v218_v10  ;;  %v219_v28 = vmul.f32 %v423_v23, %v566_v16  ;;  %v161_v32 = vpop.f32.mrb[7].mxu0  ;;  %327 = vst.msk [vmem:[#allocation2 + $0x58] sm:$0xff] %vm315_vm2, %v310_v13  ;;  %v249_v33 = vadd.f32 %v582_v26, %v226_v18  ;;  %v193_v40 = vpop.f32.mrb[7].mxu1 }
  0xe5   :  { %317 = vst.msk [vmem:[#allocation2 + $0x8] sm:$0xff] %vm315_vm2, %v300_v17  ;;  %v239_v37 = vadd.f32 %v582_v26, %v216_v19  ;;  %v227_v38 = vmul.f32 %v431_v31, %v566_v16  ;;  %v217_v39 = vmul.f32 %v566_v16, %v161_v32  ;;  %325 = vst.msk [vmem:[#allocation2 + $0x48] sm:$0xff] %vm315_vm2, %v308_v24 }
  0xe6   :  { %v289_v43 = vadd.f32 %v380_v29, %v241_v25  ;;  %v247_v44 = vadd.f32 %v582_v26, %v224_v27  ;;  %v242_v45 = vadd.f32 %v582_v26, %v219_v28  ;;  %v225_v46 = vmul.f32 %v566_v16, %v193_v40 }
  0xe7   :  { %v297_v47 = vadd.f32 %v396_v30, %v249_v33  ;;  %v287_v49 = vadd.f32 %v376_v34, %v239_v37  ;;  %v250_v50 = vadd.f32 %v582_v26, %v227_v38  ;;  %v240_v51 = vadd.f32 %v582_v26, %v217_v39 }
  0xe8   :  { %v305_v52 = vmax.f32 %v289_v43, 0.0  ;;  %v295_v29 = vadd.f32 %v392_v35, %v247_v44  ;;  %v290_v53 = vadd.f32 %v381_v36, %v242_v45  ;;  %v248_v54 = vadd.f32 %v582_v26, %v225_v46 }
  0xe9   :  { %v313_v16 = vmax.f32 %v297_v47, 0.0  ;;  %v303_v30 = vmax.f32 %v287_v49, 0.0  ;;  %v298_v34 = vadd.f32 %v397_v41, %v250_v50  ;;  %v288_v55 = vadd.f32 %v377_v42, %v240_v51 }
  0xea   :  { %322 = vst.msk [vmem:[#allocation2 + $0x30] sm:$0xff] %vm315_vm2, %v305_v52  ;;  %v311_v56 = vmax.f32 %v295_v29, 0.0  ;;  %v306_v57 = vmax.f32 %v290_v53, 0.0  ;;  %v296_v14 = vadd.f32 %v393_v48, %v248_v54 }
  0xeb   :  { %330 = vst.msk [vmem:[#allocation2 + $0x70] sm:$0xff] %vm315_vm2, %v313_v16  ;;  %320 = vst.msk [vmem:[#allocation2 + $0x20] sm:$0xff] %vm315_vm2, %v303_v30  ;;  %v314_v26 = vmax.f32 %v298_v34, 0.0  ;;  %v304_v35 = vmax.f32 %v288_v55, 0.0 }
  0xec   :  { %328 = vst.msk [vmem:[#allocation2 + $0x60] sm:$0xff] %vm315_vm2, %v311_v56  ;;  %323 = vst.msk [vmem:[#allocation2 + $0x38] sm:$0xff] %vm315_vm2, %v306_v57  ;;  %v312_v15 = vmax.f32 %v296_v14, 0.0 }
  0xed   :  { %331 = vst.msk [vmem:[#allocation2 + $0x78] sm:$0xff] %vm315_vm2, %v314_v26  ;;  %321 = vst.msk [vmem:[#allocation2 + $0x28] sm:$0xff] %vm315_vm2, %v304_v35 }
  0xee   :  { %329 = vst.msk [vmem:[#allocation2 + $0x68] sm:$0xff] %vm315_vm2, %v312_v15 }
  0xef   :  { %458 = shalt.err (!%p455_p4)
}
  0xf0   :  { %s459_s30 = scalar_lea.hbm %s674_s5, 2048 }
  0xf1   :  { %p460_p5 = scmp.ne.s32.totalorder %s674_s5, %s459_s30  ;;  %p463_p6 = scmp.lt.u32.totalorder %s459_s30, %s674_s5 }
  0xf3   :  { %p465_p7 = pnand %p463_p6, %p460_p5 }
  0xf5   :  { %468 = shalt.err (!%p465_p7)
}
  0xf6   :  { %s472_s10 = smov 128   ;;  %s473_s11 = smov 8  }
  0xf7   :  { %343 = dma.vmem_to_hbm [thread:$0]  %s338_s4, 2048, %s674_s5, [#allocation3], %s472_s10, %s472_s10, %s473_s11  }
  0xf8   :  { %469 = dma.done.wait [#allocation3], 2048  }
  0xf9   :  { %470 = vsyncadd [#allocation3], 4294965248 }
  0xfa   :  { %347 = vsyncpa [#allocation3], 1 }

// kernel: bottleneck_forward.5
= control target key start
LH: loop header
LB: loop body
LE: loop exit
PB: predicated region body
PF: predicated region fallthrough
CT: control target
= control target key end

     0   :  { %s1352_s15 = smov 0   ;;  %s1354_s16 = smov 0   ;;  %s1553_s0 = inlined_call_operand.vmem [shape: bf16[2,9,9,32], index: 0, kind: input, shape index: {}]   ;;  %s1554_s1 = inlined_call_operand.vmem [shape: bf16[2,2,32,8], index: 1, kind: input, shape index: {}]   ;;  %s1555_s2 = inlined_call_operand.vmem [shape: f32[1,8], index: 2, kind: input, shape index: {}]   ;;  %s1556_s3 = inlined_call_operand.vmem [shape: f32[1,8], index: 3, kind: input, shape index: {}]   ;;  %s1557_s4 = inlined_call_operand.vmem [shape: bf16[2,64,8], index: 4, kind: output, shape index: {}]  }
   0x1   :  { %s1356_s17 = smov 0  }
   0x2 LB: > { %s33_s18 = sadd.s32 1, %s1321_s16  ;;  %p1089_p0 = scmp.ge.s32.totalorder %s1325_s17, 1  ;;  %s1325_s17 = sphi %s1356_s17, %s14_s17   ;;  %s1321_s16 = sphi %s1354_s16, %s1561_s16   ;;  %s1317_s15 = sphi %s1352_s15, %s1560_s15  }
   0x3   : > { %p35_p1 = scmp.ge.s32.totalorder %s33_s18, 2  ;;  %p210_p2 = scmp.lt.s32.totalorder %s1325_s17, 3 }
   0x5   : > { %s1563_s18 = smov (%p35_p1, %s33_s18), 0  ;;  %p211_p3 = pnand %p1089_p0, %p210_p2 }
   0x6   : > { %v1287_v0 = vld [vmem:[%s1554_s1 + $0x20] sm:$0xff] (!%p211_p3)   ;;  %p253_p4 = scmp.lt.s32.totalorder (!%p211_p3), %s1317_s15, 1  ;;  %v1288_v1 = vld [vmem:[%s1554_s1 + $0x28] sm:$0xff] (!%p211_p3)   ;;  %v1292_v2 = vld [vmem:[%s1554_s1 + $0x10] sm:$0xff] (!%p211_p3)   ;;  %vm345_vm0 = vcmask (!%p211_p3), 261120   ;;  %vm938_vm4 = vcmask (!%p211_p3), 60416  }
   0x7   : > { %214 = sbr.rel (%p211_p3) target bundleno = 288 (0x120), region = 36  ;;  %1190 = vmatprep.subr.bf16.mxu1 (!%p211_p3), %v1287_v0  ;;  %v1293_v3 = vld [vmem:[%s1554_s1 + $0x18] sm:$0xff] (!%p211_p3)   ;;  %1214 = vmatprep.subr.bf16.mxu0 (!%p211_p3), %v1292_v2  ;;  %v1296_v4 = vld [vmem:[%s1554_s1] sm:$0xff] (!%p211_p3)   ;;  %v1396_v5 = vld [vmem:[%s1554_s1 + $0x30] sm:$0xff] (!%p211_p3)   ;;  %vm518_vm1 = vsmask.f32 (!%p211_p3), 3328 }
   0x8   : > { %1191 = vmatpush3.bf16.msra.mxu1 (!%p211_p3), %v1287_v0  ;;  %1215 = vmatpush3.bf16.msra.mxu0 (!%p211_p3), %v1292_v2  ;;  %vm519_vm2 = vsmask.f32 (!%p211_p3), 7440  ;;  %v1298_v16 = vld [vmem:[%s1554_s1 + $0x8] sm:$0xff] (!%p211_p3)  }
   0x9   : > { %1192 = vmatprep.subr.bf16.mxu1 (!%p211_p3), %v1288_v1  ;;  %1216 = vmatprep.subr.bf16.mxu0 (!%p211_p3), %v1293_v3  ;;  %vm1463_vm3 = vmor (!%p211_p3), %vm518_vm1, %vm519_vm2 }
   0xc   : > { %1193 = vmatpush3.bf16.msra.mxu1 (!%p211_p3), %v1288_v1  ;;  %1217 = vmatpush3.bf16.msra.mxu0 (!%p211_p3), %v1293_v3 }
   0xd   : > { %1202 = vmatprep.subr.bf16.mxu1 (!%p211_p3), %v1296_v4  ;;  %1226 = vmatprep.subr.bf16.mxu0 (!%p211_p3), %v1396_v5 }
   0xe   : > { %s1565_s15 = smov (!%p253_p4, %s1317_s15), 1 }
   0xf   : > { %s1262_s27 = smul.u32 72, %s1565_s15  ;;  %s1157_s21 = sshll.u32 %s1565_s15, 5 }
  0x10   : > { %s1526_s24 = scalar_lea.vmem %s1557_s4, %s1157_s21 }
  0x11   : > { %s1391_s6 = scalar_lea.vmem %s1553_s0, %s1262_s27 }
  0x12   : > { %v1399_v6 = vld [vmem:[%s1391_s6 + $0x8] sm:$0xf]  ;;  %v1402_v7 = vld [vmem:[%s1391_s6 + $0x10] sm:$0xf]  ;;  %v1405_v8 = vld [vmem:[%s1391_s6 + $0x18] sm:$0xf] }
  0x13   : > { %v1097_v9 = vcombine.low %v1399_v6, %v1402_v7  ;;  %v1410_v10 = vld [vmem:[%s1391_s6 + $0x20] sm:$0xf]  ;;  %v1413_v11 = vld [vmem:[%s1391_s6 + $0x28] sm:$0xf]  ;;  %v550_v12 = vshrl.u32 %v1402_v7, 16  ;;  %v553_v13 = vshll.u32 %v1402_v7, 16  ;;  %v1108_v30 = vcombine.low %v1402_v7, %v1405_v8 }
  0x14   : > { %v1098_v14 = vcombine.low %v1405_v8, %v1410_v10  ;;  %v1420_v15 = vld [vmem:[%s1391_s6 + $0x30] sm:$0xf]  ;;  %v536_v17 = vshrl.u32 %v1399_v6, 16  ;;  %v539_v18 = vshll.u32 %v1399_v6, 16  ;;  %v578_v19 = vshrl.u32 %v1410_v10, 16 }
  0x15   : > { %1194 = vmatprep.mubr.msk.bf16.mxu1 %vm345_vm0, %v1097_v9  ;;  %v1099_v20 = vcombine.low %v1413_v11, %v1420_v15  ;;  %v552_v21 = vrot.slane %v550_v12, 4  ;;  %v555_v22 = vrot.slane %v553_v13, 5  ;;  %v1434_v23 = vld [vmem:[%s1391_s6 + $0x38] sm:$0xf]  ;;  %v1437_v24 = vld [vmem:[%s1391_s6 + $0x40] sm:$0xf]  ;;  %v1109_v3 = vcombine.low %v1410_v10, %v1413_v11 }
  0x16   : > { %1195 = vmatmul.mubr.msk.bf16.vlgmr.msra.gmra.mrb[0].mxu1 %vm345_vm0, %v1098_v14  ;;  %v581_v25 = vshll.u32 %v1410_v10, 16  ;;  %v592_v26 = vshrl.u32 %v1413_v11, 16  ;;  %v595_v27 = vshll.u32 %v1413_v11, 16  ;;  %v606_v28 = vshrl.u32 %v1420_v15, 16  ;;  %v286_v29 = vld [vmem:[%s1391_s6] sm:$0xf] }
  0x17   : > { %1198 = vmatprep.mubr.msk.bf16.mxu1 %vm345_vm0, %v1099_v20  ;;  %1203 = vmatpush3.bf16.msra.mxu1 %v1296_v4  ;;  %v609_v31 = vshll.u32 %v1420_v15, 16  ;;  %v287_v32 = vld [vmem:[%s1391_s6 + $0x4] sm:$0x1]  ;;  %v289_v33 = vld [vmem:[%s1391_s6 + $0xc] sm:$0x1]  ;;  %v522_v34 = vshrl.u32 %v286_v29, 16  ;;  %v556_v35 = vor.u32 %v555_v22, %v552_v21  ;;  %v1100_v36 = vcombine.low %v1434_v23, %v1437_v24 }
  0x18   : > { %1204 = vmatprep.subr.bf16.mxu1 %v1298_v16  ;;  %v620_v37 = vshrl.u32 %v1434_v23, 16  ;;  %v623_v38 = vshll.u32 %v1434_v23, 16  ;;  %v291_v39 = vld [vmem:[%s1391_s6 + $0x14] sm:$0x1]  ;;  %v525_v40 = vshll.u32 %v286_v29, 16  ;;  %v531_v43 = vshll.u32 %v287_v32, 16 }
  0x19   : > { %v293_v41 = vld [vmem:[%s1391_s6 + $0x1c] sm:$0x1]  ;;  %v524_v42 = vrot.slane %v522_v34, 4  ;;  %v538_v44 = vrot.slane %v536_v17, 4  ;;  %v1107_v45 = vcombine.low %v286_v29, %v1399_v6  ;;  %v541_v47 = vrot.slane %v539_v18, 5 }
  0x1a   : > { %v527_v46 = vrot.slane %v525_v40, 5  ;;  %v545_v48 = vshll.u32 %v289_v33, 16  ;;  %v557_v49 = vrot.slane %v556_v35, 4  ;;  %v533_v50 = vrot.slane %v531_v43, 5  ;;  %v295_v54 = vld [vmem:[%s1391_s6 + $0x24] sm:$0x1] }
  0x1b   : > { %1205 = vmatpush3.bf16.msra.mxu1 %v1298_v16  ;;  %v559_v51 = vshll.u32 %v291_v39, 16  ;;  %v564_v52 = vshrl.u32 %v1405_v8, 16  ;;  %v567_v53 = vshll.u32 %v1405_v8, 16  ;;  %v542_v56 = vor.u32 %v541_v47, %v538_v44  ;;  %v297_v12 = vld [vmem:[%s1391_s6 + $0x2c] sm:$0x1] }
  0x1c   : > { %v528_v55 = vor.u32 %v527_v46, %v524_v42  ;;  %v547_v57 = vrot.slane %v545_v48, 5  ;;  %v573_v58 = vshll.u32 %v293_v41, 16  ;;  %v580_v63 = vrot.slane %v578_v19, 4  ;;  %v299_v19 = vld [vmem:[%s1391_s6 + $0x34] sm:$0x1]  ;;  %v1300_v42 = vld [vmem:[%s1554_s1 + $0x38] sm:$0xff]  }
  0x1d   : > { %v561_v60 = vrot.slane %v559_v51, 5  ;;  %v566_v61 = vrot.slane %v564_v52, 4  ;;  %v569_v62 = vrot.slane %v567_v53, 5  ;;  %v543_v1 = vrot.slane %v542_v56, 4  ;;  %v301_v33 = vld [vmem:[%s1391_s6 + $0x3c] sm:$0x1] }
  0x1e   : > { %1199 = vmatmul.mubr.msk.bf16.gmra.mrb[4].mxu1 %vm345_vm0, %v1100_v36  ;;  %v529_v0 = vrot.slane %v528_v55, 4  ;;  %v583_v2 = vrot.slane %v581_v25, 5  ;;  %v575_v6 = vrot.slane %v573_v58, 5  ;;  %v587_v9 = vshll.u32 %v295_v54, 16  ;;  %v303_v53 = vld [vmem:[%s1391_s6 + $0x44] sm:$0x1] }
  0x1f   : > { %1206 = vmatprep.mubr.msk.bf16.mxu1 %vm345_vm0, %v1107_v45  ;;  %v570_v4 = vor.u32 %v569_v62, %v566_v61  ;;  %v594_v13 = vrot.slane %v592_v26, 4  ;;  %v548_v16 = vsel %vm1463_vm3, %v543_v1, %v547_v57  ;;  %v597_v18 = vrot.slane %v595_v27, 5 }
  0x20   : > { %v534_v14 = vsel %vm1463_vm3, %v529_v0, %v533_v50  ;;  %v584_v17 = vor.u32 %v583_v2, %v580_v63  ;;  %v562_v20 = vsel %vm1463_vm3, %v557_v49, %v561_v60  ;;  %v589_v10 = vrot.slane %v587_v9, 5  ;;  %v1145_v9 = vld [vmem:[%s1555_s2] ss:$0 sm:$0xff] }
  0x21   : > { %v571_v21 = vrot.slane %v570_v4, 4  ;;  %v1121_v11 = vcombine.low %v534_v14, %v548_v16  ;;  %v598_v25 = vor.u32 %v597_v18, %v594_v13  ;;  %v601_v29 = vshll.u32 %v297_v12, 16  ;;  %v1146_v13 = vld [vmem:[%s1556_s3] ss:$0 sm:$0xff] }
  0x22   : > { %v585_v22 = vrot.slane %v584_v17, 4  ;;  %v608_v26 = vrot.slane %v606_v28, 4  ;;  %v611_v34 = vrot.slane %v609_v31, 5  ;;  %v615_v35 = vshll.u32 %v299_v19, 16 }
  0x23   : > { %v576_v32 = vsel %vm1463_vm3, %v571_v21, %v575_v6  ;;  %1218 = vmatprep.mubr.msk.bf16.mxu0 %vm345_vm0, %v1121_v11  ;;  %v622_v27 = vrot.slane %v620_v37, 4  ;;  %v599_v40 = vrot.slane %v598_v25, 4  ;;  %v603_v41 = vrot.slane %v601_v29, 5 }
  0x24   : > { %v590_v36 = vsel %vm1463_vm3, %v585_v22, %v589_v10  ;;  %v1122_v39 = vcombine.low %v562_v20, %v576_v32  ;;  %v612_v28 = vor.u32 %v611_v34, %v608_v26  ;;  %v617_v43 = vrot.slane %v615_v35, 5 }
  0x25   : > { %v625_v31 = vrot.slane %v623_v38, 5  ;;  %v634_v37 = vshrl.u32 %v1437_v24, 16  ;;  %v604_v44 = vsel %vm1463_vm3, %v599_v40, %v603_v41  ;;  %v629_v45 = vshll.u32 %v301_v33, 16 }
  0x26   : > { %1207 = vmatmul.mubr.msk.bf16.vlgmr.msra.gmra.mrb[0].mxu1 %vm345_vm0, %v1108_v30  ;;  %1219 = vmatmul.mubr.msk.bf16.vlgmr.msra.gmra.mrb[0].mxu0 %vm345_vm0, %v1122_v39  ;;  %v637_v46 = vshll.u32 %v1437_v24, 16  ;;  %v1123_v7 = vcombine.low %v590_v36, %v604_v44  ;;  %v613_v8 = vrot.slane %v612_v28, 4  ;;  %v1110_v49 = vcombine.low %v1420_v15, %v1434_v23 }
  0x27   : > { %1210 = vmatprep.mubr.msk.bf16.mxu1 %vm345_vm0, %v1109_v3  ;;  %1227 = vmatpush3.bf16.msra.mxu0 %v1396_v5  ;;  %v626_v30 = vor.u32 %v625_v31, %v622_v27  ;;  %v631_v38 = vrot.slane %v629_v45, 5  ;;  %v636_v50 = vrot.slane %v634_v37, 4  ;;  %v1135_v24 = vcombine.low %v548_v16, %v562_v20 }
  0x28   : > { %1228 = vmatprep.subr.bf16.mxu0 %v1300_v42  ;;  %1222 = vmatprep.mubr.msk.bf16.mxu0 %vm345_vm0, %v1123_v7  ;;  %v618_v47 = vsel %vm1463_vm3, %v613_v8, %v617_v43  ;;  %v639_v51 = vrot.slane %v637_v46, 5  ;;  %v643_v55 = vshll.u32 %v303_v53, 16  ;;  %v1136_v56 = vcombine.low %v576_v32, %v590_v36 }
  0x29   : > { %v627_v48 = vrot.slane %v626_v30, 4  ;;  %v1137_v57 = vcombine.low %v604_v44, %v618_v47 }
  0x2a   : > { %v640_v54 = vor.u32 %v639_v51, %v636_v50  ;;  %v645_v23 = vrot.slane %v643_v55, 5 }
  0x2b   : > { %v632_v5 = vsel %vm1463_vm3, %v627_v48, %v631_v38  ;;  %1229 = vmatpush3.bf16.msra.mxu0 %v1300_v42 }
  0x2c   : > { %v1124_v52 = vcombine.low %v618_v47, %v632_v5  ;;  %v641_v15 = vrot.slane %v640_v54, 4 }
  0x2e   : > { %1211 = vmatmul.mubr.msk.bf16.gmra.mrb[4].mxu1 %vm345_vm0, %v1110_v49  ;;  %1223 = vmatmul.mubr.msk.bf16.gmra.mrb[4].mxu0 %vm345_vm0, %v1124_v52  ;;  %v646_v58 = vsel %vm1463_vm3, %v641_v15, %v645_v23 }
  0x2f   : > { %1230 = vmatprep.mubr.msk.bf16.mxu0 %vm345_vm0, %v1135_v24  ;;  %v1138_v60 = vcombine.low %v632_v5, %v646_v58 }
  0x36   : > { %1231 = vmatmul.mubr.msk.bf16.vlgmr.msra.gmra.mrb[0].mxu0 %vm345_vm0, %v1136_v56 }
  0x37   : > { %1234 = vmatprep.mubr.msk.bf16.mxu0 %vm345_vm0, %v1137_v57 }
  0x3e   : > { %1235 = vmatmul.mubr.msk.bf16.gmra.mrb[4].mxu0 %vm345_vm0, %v1138_v60 }
  0xf9   : > { %v1208_v61 = vpop.f32.mrb[0].mxu1 }
  0xfa   : > { %v487_v62 = vpop.f32.mrb[1].mxu1 }
  0xfb   : > { %v1209_v63 = vpop.f32.mrb[2].mxu1 }
  0xfc   : > { %v490_v0 = vpop.f32.mrb[3].mxu1 }
 0x101   : > { %v1212_v1 = vpop.f32.mrb[4].mxu1 }
 0x102   : > { %v503_v2 = vpop.f32.mrb[5].mxu1 }
 0x103   : > { %v1213_v3 = vpop.f32.mrb[6].mxu1 }
 0x104   : > { %v506_v4 = vpop.f32.mrb[7].mxu1 }
 0x109   : > { %v1232_v6 = vpop.f32.mrb[0].mxu0 }
 0x10a   : > { %v1238_v12 = vadd.f32 %v1232_v6, %v1208_v61  ;;  %v829_v59 = vpop.f32.mrb[1].mxu0 }
 0x10b   : > { %v1239_v14 = vadd.f32 %v829_v59, %v487_v62  ;;  %v1233_v16 = vpop.f32.mrb[2].mxu0 }
 0x10c   : > { %v877_v17 = vmul.f32 %v1238_v12, %v1145_v9  ;;  %v1240_v18 = vadd.f32 %v1233_v16, %v1209_v63  ;;  %v832_v19 = vpop.f32.mrb[3].mxu0 }
 0x10d   : > { %v875_v20 = vmul.f32 %v1239_v14, %v1145_v9  ;;  %v1241_v21 = vadd.f32 %v832_v19, %v490_v0 }
 0x10e   : > { %v892_v10 = vadd.f32 %v1146_v13, %v877_v17  ;;  %v878_v11 = vmul.f32 %v1240_v18, %v1145_v9 }
 0x10f   : > { %v890_v22 = vadd.f32 %v1146_v13, %v875_v20  ;;  %v876_v25 = vmul.f32 %v1241_v21, %v1145_v9 }
 0x110   : > { %v900_v29 = vmax.f32 %v892_v10, 0.0  ;;  %v893_v26 = vadd.f32 %v1146_v13, %v878_v11 }
 0x111   : > { %v898_v32 = vmax.f32 %v890_v22, 0.0  ;;  %v891_v33 = vadd.f32 %v1146_v13, %v876_v25  ;;  %v1236_v34 = vpop.f32.mrb[4].mxu0 }
 0x112   : > { %v1160_v35 = vpack.c.bf16 %v900_v29, %v900_v29  ;;  %v901_v27 = vmax.f32 %v893_v26, 0.0  ;;  %v1242_v36 = vadd.f32 %v1236_v34, %v1212_v1  ;;  %v845_v39 = vpop.f32.mrb[5].mxu0 }
 0x113   : > { %v1158_v40 = vpack.c.bf16 %v898_v32, %v898_v32  ;;  %v899_v41 = vmax.f32 %v891_v33, 0.0  ;;  %v1243_v42 = vadd.f32 %v845_v39, %v503_v2  ;;  %v1237_v28 = vpop.f32.mrb[6].mxu0 }
 0x114   : > { %941 = vst.msk [vmem:[%s1526_s24 + $0x8] sm:$0xf] %vm938_vm4, %v1160_v35  ;;  %v1161_v43 = vpack.c.bf16 %v901_v27, %v901_v27  ;;  %v881_v31 = vmul.f32 %v1242_v36, %v1145_v9  ;;  %v1244_v37 = vadd.f32 %v1237_v28, %v1213_v3  ;;  %v848_v44 = vpop.f32.mrb[7].mxu0 }
 0x115   : > { %939 = vst.msk [vmem:[%s1526_s24] sm:$0xf] %vm938_vm4, %v1158_v40  ;;  %v1159_v45 = vpack.c.bf16 %v899_v41, %v899_v41  ;;  %v879_v46 = vmul.f32 %v1243_v42, %v1145_v9  ;;  %v1245_v7 = vadd.f32 %v848_v44, %v506_v4 }
 0x116   : > { %942 = vst.msk [vmem:[%s1526_s24 + $0xc] sm:$0xf] %vm938_vm4, %v1161_v43  ;;  %v896_v8 = vadd.f32 %v1146_v13, %v881_v31  ;;  %v882_v30 = vmul.f32 %v1244_v37, %v1145_v9 }
 0x117   : > { %940 = vst.msk [vmem:[%s1526_s24 + $0x4] sm:$0xf] %vm938_vm4, %v1159_v45  ;;  %v894_v38 = vadd.f32 %v1146_v13, %v879_v46  ;;  %v880_v47 = vmul.f32 %v1245_v7, %v1145_v9 }
 0x118   : > { %v904_v48 = vmax.f32 %v896_v8, 0.0  ;;  %v897_v49 = vadd.f32 %v1146_v13, %v882_v30 }
 0x119   : > { %v902_v50 = vmax.f32 %v894_v38, 0.0  ;;  %v895_v51 = vadd.f32 %v1146_v13, %v880_v47 }
 0x11a   : > { %v1164_v24 = vpack.c.bf16 %v904_v48, %v904_v48  ;;  %v905_v5 = vmax.f32 %v897_v49, 0.0 }
 0x11b   : > { %v1162_v52 = vpack.c.bf16 %v902_v50, %v902_v50  ;;  %v903_v53 = vmax.f32 %v895_v51, 0.0 }
 0x11c   : > { %945 = vst.msk [vmem:[%s1526_s24 + $0x18] sm:$0xf] %vm938_vm4, %v1164_v24  ;;  %v1165_v54 = vpack.c.bf16 %v905_v5, %v905_v5 }
 0x11d   : > { %943 = vst.msk [vmem:[%s1526_s24 + $0x10] sm:$0xf] %vm938_vm4, %v1162_v52  ;;  %v1163_v55 = vpack.c.bf16 %v903_v53, %v903_v53 }
 0x11e   : > { %946 = vst.msk [vmem:[%s1526_s24 + $0x1c] sm:$0xf] %vm938_vm4, %v1165_v54 }
 0x11f   : > { %944 = vst.msk [vmem:[%s1526_s24 + $0x14] sm:$0xf] %vm938_vm4, %v1163_v55 }
 0x120 PF: > { %s14_s17 = sadd.s32 1, %s1325_s17   ;;  %s1560_s15 = smov %s1321_s16 }
 0x121   : > { %p11_p5 = scmp.ge.s32.totalorder %s14_s17, 4   ;;  %s1561_s16 = smov %s1563_s18 }
 0x123   :  { %13 = sbr.rel (!%p11_p5) target bundleno = 2 (0x2), region = 79 }

</bundles_post_ra>
